<compile_context>
chip_gen: v7x
topology: tpu7x:2x2x1
jax: 0.10.0
libtpu: 0.0.40
codegen_flags: <defaults>
</compile_context>

<pallas_src>
import jax
import jax.numpy as jnp
from jax.experimental import pallas as pl
from jax.experimental.pallas import tpu as pltpu

EPS = 1e-5  # torch.nn.InstanceNorm2d default


def _instance_norm_prelu(h, gamma, beta, alpha):
    """h: (C, HW) f32; gamma/beta: (C, 1); alpha: scalar.

    One-pass statistics (E[h^2] - mu^2), biased var, eps=1e-5, affine + PReLU."""
    mu = jnp.mean(h, axis=1, keepdims=True)
    var = jnp.maximum(jnp.mean(h * h, axis=1, keepdims=True) - mu * mu, 0.0)
    hn = (h - mu) * jax.lax.rsqrt(var + EPS) * gamma + beta
    return jnp.where(hn >= 0, hn, alpha * hn)


def _conv3x3_edge_mask(H, W):
    """(9, H*W) f32 validity mask for the 9 shifted 3x3 taps (zero padding)."""
    ys = jnp.repeat(jnp.arange(H), W)
    xs = jnp.tile(jnp.arange(W), H)
    rows = []
    for dy in (-1, 0, 1):
        for dx in (-1, 0, 1):
            valid = ((ys + dy >= 0) & (ys + dy < H) &
                     (xs + dx >= 0) & (xs + dx < W))
            rows.append(valid.astype(jnp.float32))
    return jnp.stack(rows, axis=0)


def _make_chain_kernel(fuse_flags, H, W, with_y, return_xf):
    HW = H * W
    num_abfs = len(fuse_flags)

    def kernel(*refs):
        it = iter(refs)
        x_ref = next(it)
        y_ref = next(it) if with_y else None
        mask_ref = next(it)
        scal_ref = next(it)                      # SMEM: 4 scalars per ABF
        abf_w = []
        for fuse in fuse_flags:
            w1 = next(it)
            gb1 = next(it)
            watt = next(it) if fuse else None
            w2 = next(it)
            gb2 = next(it)
            abf_w.append((w1, gb1, watt, w2, gb2))
        out_refs = [next(it) for _ in range(num_abfs)]
        xf_ref = next(it) if return_xf else None

        x = x_ref[...].astype(jnp.float32)       # (Cin, HW), resident for all ABFs
        mask = mask_ref[...]                     # (9, HW) f32
        res = y_ref[...].astype(jnp.float32) if with_y else None

        for a, (fuse, (w1_ref, gb1_ref, watt_ref, w2_ref, gb2_ref)) in enumerate(
                zip(fuse_flags, abf_w)):
            sbase = 4 * a
            a1 = scal_ref[sbase + 0]
            a2 = scal_ref[sbase + 1]

            # ---- conv1: 1x1 conv == (Cmid, Cin) @ (Cin, HW), f32 accumulation --
            h = jnp.dot(w1_ref[...], x, preferred_element_type=jnp.float32)
            gb1 = gb1_ref[...]
            hp = _instance_norm_prelu(h, gb1[:, 0:1], gb1[:, 1:2], a1)
            Cmid = hp.shape[0]

            # ---- attention fuse (only when the ABF has att_conv) ---------------
            if fuse:
                watt = watt_ref[...]             # (2, 2*Cmid) = [wax | way]
                zl = (jnp.dot(watt[:, :Cmid], hp,
                              preferred_element_type=jnp.float32) +
                      jnp.dot(watt[:, Cmid:], res,
                              preferred_element_type=jnp.float32))
                z0 = jax.nn.sigmoid(zl[0:1, :] + scal_ref[sbase + 2])
                z1 = jax.nn.sigmoid(zl[1:2, :] + scal_ref[sbase + 3])
                xf = hp * z0 + res * z1
            else:
                xf = hp

            # ---- conv2: 3x3, pad=1.  Nine in-register rolled taps (XLU lane
            #      roll + precomputed edge mask), accumulated matmuls: the
            #      (9*Cmid, HW) im2col tensor is never materialized. -----------
            w2 = w2_ref[...]                     # (Cout, 9*Cmid), tap-major
            acc = None
            for t in range(9):
                dy, dx = t // 3 - 1, t % 3 - 1
                s = dy * W + dx                  # flattened source offset
                if s == 0:
                    tap = xf
                else:
                    tap = pltpu.roll(xf, shift=(-s) % HW, axis=1) * mask[t:t + 1, :]
                contrib = jnp.dot(w2[:, t * Cmid:(t + 1) * Cmid], tap,
                                  preferred_element_type=jnp.float32)
                acc = contrib if acc is None else acc + contrib

            gb2 = gb2_ref[...]
            out = _instance_norm_prelu(acc, gb2[:, 0:1], gb2[:, 1:2], a2)
            out_refs[a][...] = out.astype(out_refs[a].dtype)   # lane-dense store

            res = xf                             # residual stays resident in VMEM

        if return_xf:
            xf_ref[...] = res.astype(xf_ref.dtype)

    return kernel


def abf_chain_forward(x_nchw, abf_params, *, y_nchw=None,
                      storage_dtype=jnp.float32, out_dtype=jnp.float32,
                      return_xf=False):
    """Run a chain of ABF blocks (all fed the same x) in ONE pallas_call.

    abf_params is in execution order; each dict has w1 (Cmid,Cin), gb1 (Cmid,2),
    w2 (Cout,9*Cmid tap-major), gb2 (Cout,2), a1, a2 and (for fuse blocks)
    watt (2,2*Cmid) = [wax|way], batt (2,).  Returns [out_0..out_k] in execution
    order (and optionally the final x_fused)."""
    N, Cin, H, W = x_nchw.shape
    HW = H * W
    num_abfs = len(abf_params)
    fuse_flags = tuple(("watt" in p) for p in abf_params)
    with_y = y_nchw is not None
    if fuse_flags and fuse_flags[0] and not with_y:
        raise ValueError("first ABF has att_conv (fuse=True) but no y was given")

    sd = storage_dtype
    x = x_nchw.reshape(N, Cin, HW).astype(sd)      # NCHW -> (N, C, HW): free reshape
    mask9 = _conv3x3_edge_mask(H, W)

    # All tiny scalars (PReLU alphas + attention biases) of the whole chain -> one
    # flat SMEM vector (4 per ABF).
    scal_list = []
    for p in abf_params:
        batt = p.get("batt", jnp.zeros((2,), jnp.float32))
        scal_list += [jnp.asarray(p["a1"], jnp.float32),
                      jnp.asarray(p["a2"], jnp.float32),
                      jnp.asarray(batt[0], jnp.float32),
                      jnp.asarray(batt[1], jnp.float32)]
    scal = jnp.stack(scal_list)

    rep = lambda a: pl.BlockSpec(a.shape, lambda n, _nd=a.ndim: (0,) * _nd)
    per_n = lambda c: pl.BlockSpec((None, c, HW), lambda n: (n, 0, 0))
    smem_spec = pl.BlockSpec(memory_space=pltpu.MemorySpace.SMEM)

    inputs = [x]
    in_specs = [per_n(Cin)]
    if with_y:
        cy = y_nchw.shape[1]
        inputs.append(y_nchw.reshape(N, cy, HW).astype(sd))
        in_specs.append(per_n(cy))
    inputs += [mask9, scal]
    in_specs += [rep(mask9), smem_spec]

    for p, fuse in zip(abf_params, fuse_flags):
        w1 = p["w1"].astype(jnp.float32)           # weights stay f32 (tiny; MXU is
        gb1 = p["gb1"].astype(jnp.float32)         # ~3% occupied, bf16 buys nothing)
        w2 = p["w2"].astype(jnp.float32)
        gb2 = p["gb2"].astype(jnp.float32)
        if fuse:
            watt = p["watt"].astype(jnp.float32)
            inputs += [w1, gb1, watt, w2, gb2]
            in_specs += [rep(w1), rep(gb1), rep(watt), rep(w2), rep(gb2)]
        else:
            inputs += [w1, gb1, w2, gb2]
            in_specs += [rep(w1), rep(gb1), rep(w2), rep(gb2)]

    couts = [p["w2"].shape[0] for p in abf_params]
    out_shapes = [jax.ShapeDtypeStruct((N, c, HW), out_dtype) for c in couts]
    out_specs = [per_n(c) for c in couts]
    if return_xf:
        cmid_last = abf_params[-1]["w1"].shape[0]
        out_shapes.append(jax.ShapeDtypeStruct((N, cmid_last, HW), sd))
        out_specs.append(per_n(cmid_last))

    results = pl.pallas_call(
        _make_chain_kernel(fuse_flags, H, W, with_y, return_xf),
        out_shape=tuple(out_shapes),
        grid=(N,),
        in_specs=in_specs,
        out_specs=tuple(out_specs),
        compiler_params=pltpu.CompilerParams(
            dimension_semantics=("parallel",),
            vmem_limit_bytes=32 * 1024 * 1024),
    )(*inputs)

    outs = [r.reshape(N, c, H, W) for r, c in zip(results[:num_abfs], couts)]
    if return_xf:
        xf = results[num_abfs].reshape(N, abf_params[-1]["w1"].shape[0], H, W)
        return outs, xf
    return outs


def reskd_mid_trans_forward(student_features, abf_params, *,
                            storage_dtype=jnp.float32, out_dtype=jnp.float32):
    """ResKD_mid_trans.forward.  `abf_params` is in execution (reversed-module)
    order: abf_params[0] is the fuse=False ABF; the rest are fuse=True ABFs that
    consume the previous block's x_fused.  Returned list matches the torch
    ordering (results.insert(0, ...)), i.e. reverse execution order."""
    outs = abf_chain_forward(student_features, abf_params,
                             storage_dtype=storage_dtype, out_dtype=out_dtype)
    return list(reversed(outs))


# ----------------------------- test scaffolding ------------------------------

def make_abf_params(key, cin, cmid, cout, fuse):
    """Synthetic parameters in the kernel's packed layout.
    (Torch conv2 weight (Cout,Cmid,3,3) would map via permute(0,2,3,1).reshape.)"""
    ks = jax.random.split(key, 8)
    p = dict(
        w1=0.2 * jax.random.normal(ks[0], (cmid, cin), jnp.float32),
        gb1=jnp.concatenate(
            [1.0 + 0.1 * jax.random.normal(ks[1], (cmid, 1), jnp.float32),
             0.1 * jax.random.normal(ks[2], (cmid, 1), jnp.float32)], axis=1),
        a1=jnp.asarray(0.25, jnp.float32),
        w2=0.2 * jax.random.normal(ks[3], (cout, 9 * cmid), jnp.float32),
        gb2=jnp.concatenate(
            [1.0 + 0.1 * jax.random.normal(ks[4], (cout, 1), jnp.float32),
             0.1 * jax.random.normal(ks[5], (cout, 1), jnp.float32)], axis=1),
        a2=jnp.asarray(0.25, jnp.float32),
    )
    if fuse:
        p["watt"] = 0.2 * jax.random.normal(ks[6], (2, 2 * cmid), jnp.float32)
        p["batt"] = 0.1 * jax.random.normal(ks[7], (2,), jnp.float32)
    return p


def ref_abf(x, p, y=None):
    """Pure-JAX NCHW reference (same math as the torch ABF, no Pallas)."""
    N, _, H, W = x.shape
    Cout = p["w2"].shape[0]
    Cmid = p["w1"].shape[0]

    def conv1x1(w_oi, t):
        return jnp.einsum("oi,nihw->nohw", w_oi, t)

    def in_prelu(t, gb, a):
        mu = t.mean(axis=(2, 3), keepdims=True)
        var = ((t - mu) ** 2).mean(axis=(2, 3), keepdims=True)
        tn = (t - mu) * jax.lax.rsqrt(var + EPS)
        tn = tn * gb[:, 0].reshape(1, -1, 1, 1) + gb[:, 1].reshape(1, -1, 1, 1)
        return jnp.where(tn >= 0, tn, a * tn)

    h = in_prelu(conv1x1(p["w1"], x), p["gb1"], p["a1"])
    if y is not None:
        wax, way = p["watt"][:, :Cmid], p["watt"][:, Cmid:]
        zl = conv1x1(wax, h) + conv1x1(way, y) + p["batt"].reshape(1, 2, 1, 1)
        z = jax.nn.sigmoid(zl)
        xf = h * z[:, 0:1] + y * z[:, 1:2]
    else:
        xf = h
    w2 = p["w2"].reshape(Cout, 9, Cmid)
    xp = jnp.pad(xf, ((0, 0), (0, 0), (1, 1), (1, 1)))
    acc = jnp.zeros((N, Cout, H, W), jnp.float32)
    for t in range(9):
        dy, dx = t // 3, t % 3
        acc = acc + conv1x1(w2[:, t, :], xp[:, :, dy:dy + H, dx:dx + W])
    return in_prelu(acc, p["gb2"], p["a2"]), xf


def ref_reskd(x, abf_params):
    out, res = ref_abf(x, abf_params[0], None)
    results = [out]
    for p in abf_params[1:]:
        out, res = ref_abf(x, p, res)
        results.insert(0, out)
    return results


if __name__ == "__main__":
    key = jax.random.PRNGKey(0)
    kx, ky, kp = jax.random.split(key, 3)

    # ResKD_mid_trans with equal in_channels (the torch forward feeds the same x to
    # every ABF).  abf_params are in execution order: first fuse=False, rest fuse=True.
    N, Cin, Cmid, H, W = 2, 4, 8, 16, 16
    out_channels = [8, 16, 8]
    x = jax.random.normal(kx, (N, Cin, H, W), jnp.float32)

    kps = jax.random.split(kp, len(out_channels))
    abf_params = [make_abf_params(kps[i], Cin, Cmid, out_channels[i], fuse=(i > 0))
                  for i in range(len(out_channels))]

    # --- full ResKD_mid_trans forward (ONE fused pallas_call), f32: tight check ---
    outs = reskd_mid_trans_forward(x, abf_params)
    jax.block_until_ready(outs)
    refs = ref_reskd(x, abf_params)
    assert len(outs) == len(refs)
    for o, r in zip(outs, refs):
        assert o.shape == r.shape
        assert jnp.allclose(o, r, atol=5e-3, rtol=5e-3), float(jnp.max(jnp.abs(o - r)))

    # --- single ABF, fuse=True path with external y: check (y_out, x_fused) ---
    y_in = jax.random.normal(ky, (N, Cmid, H, W), jnp.float32)
    (o_k,), xf_k = abf_chain_forward(x, [abf_params[1]], y_nchw=y_in, return_xf=True)
    jax.block_until_ready((o_k, xf_k))
    o_r, xf_r = ref_abf(x, abf_params[1], y_in)
    assert jnp.allclose(o_k, o_r, atol=2e-3, rtol=2e-3), float(jnp.max(jnp.abs(o_k - o_r)))
    assert jnp.allclose(xf_k, xf_r, atol=2e-3, rtol=2e-3)

    # --- single ABF, fuse=False path ---
    (o_k2,), xf_k2 = abf_chain_forward(x, [abf_params[0]], return_xf=True)
    jax.block_until_ready((o_k2, xf_k2))
    o_r2, xf_r2 = ref_abf(x, abf_params[0])
    assert jnp.allclose(o_k2, o_r2, atol=2e-3, rtol=2e-3)
    assert jnp.allclose(xf_k2, xf_r2, atol=2e-3, rtol=2e-3)

    # --- bf16 activation-storage path (halved HBM traffic, f32 math): loose check ---
    outs_bf = reskd_mid_trans_forward(x, abf_params, storage_dtype=jnp.bfloat16)
    jax.block_until_ready(outs_bf)
    for o, r in zip(outs_bf, refs):
        assert jnp.allclose(o, r, atol=1e-1, rtol=1e-1)

    print("KERNEL_OK")
</pallas_src>

<mosaic_0001>
module attributes {stable_mosaic.version = 11 : i64} {
  func.func @kernel(%arg0: i32, %arg1: memref<1x4x256xf32, #tpu.memory_space<vmem>>, %arg2: memref<9x256xf32, #tpu.memory_space<vmem>>, %arg3: memref<12xf32, #tpu.memory_space<smem>>, %arg4: memref<8x4xf32, #tpu.memory_space<vmem>>, %arg5: memref<8x2xf32, #tpu.memory_space<vmem>>, %arg6: memref<8x72xf32, #tpu.memory_space<vmem>>, %arg7: memref<8x2xf32, #tpu.memory_space<vmem>>, %arg8: memref<8x4xf32, #tpu.memory_space<vmem>>, %arg9: memref<8x2xf32, #tpu.memory_space<vmem>>, %arg10: memref<2x16xf32, #tpu.memory_space<vmem>>, %arg11: memref<16x72xf32, #tpu.memory_space<vmem>>, %arg12: memref<16x2xf32, #tpu.memory_space<vmem>>, %arg13: memref<8x4xf32, #tpu.memory_space<vmem>>, %arg14: memref<8x2xf32, #tpu.memory_space<vmem>>, %arg15: memref<2x16xf32, #tpu.memory_space<vmem>>, %arg16: memref<8x72xf32, #tpu.memory_space<vmem>>, %arg17: memref<8x2xf32, #tpu.memory_space<vmem>>, %arg18: memref<1x8x256xf32, #tpu.memory_space<vmem>>, %arg19: memref<1x16x256xf32, #tpu.memory_space<vmem>>, %arg20: memref<1x8x256xf32, #tpu.memory_space<vmem>>) attributes {dimension_semantics = [#tpu.dimension_semantics<parallel>], iteration_bounds = array<i64: 2>, scalar_prefetch = 0 : i64, scratch_operands = 0 : i64, tpu.core_type = #tpu.core_type<tc>, window_params = [{transform_indices = @transform_0, window_bounds = array<i64: 1, 4, 256>}, {pipeline_mode = #tpu.pipeline_mode<synchronous>, transform_indices = @transform_1, window_bounds = array<i64: 9, 256>}, {transform_indices = @transform_2, window_bounds = array<i64: 12>}, {pipeline_mode = #tpu.pipeline_mode<synchronous>, transform_indices = @transform_3, window_bounds = array<i64: 8, 4>}, {pipeline_mode = #tpu.pipeline_mode<synchronous>, transform_indices = @transform_4, window_bounds = array<i64: 8, 2>}, {pipeline_mode = #tpu.pipeline_mode<synchronous>, transform_indices = @transform_5, window_bounds = array<i64: 8, 72>}, {pipeline_mode = #tpu.pipeline_mode<synchronous>, transform_indices = @transform_6, window_bounds = array<i64: 8, 2>}, {pipeline_mode = #tpu.pipeline_mode<synchronous>, transform_indices = @transform_7, window_bounds = array<i64: 8, 4>}, {pipeline_mode = #tpu.pipeline_mode<synchronous>, transform_indices = @transform_8, window_bounds = array<i64: 8, 2>}, {pipeline_mode = #tpu.pipeline_mode<synchronous>, transform_indices = @transform_9, window_bounds = array<i64: 2, 16>}, {pipeline_mode = #tpu.pipeline_mode<synchronous>, transform_indices = @transform_10, window_bounds = array<i64: 16, 72>}, {pipeline_mode = #tpu.pipeline_mode<synchronous>, transform_indices = @transform_11, window_bounds = array<i64: 16, 2>}, {pipeline_mode = #tpu.pipeline_mode<synchronous>, transform_indices = @transform_12, window_bounds = array<i64: 8, 4>}, {pipeline_mode = #tpu.pipeline_mode<synchronous>, transform_indices = @transform_13, window_bounds = array<i64: 8, 2>}, {pipeline_mode = #tpu.pipeline_mode<synchronous>, transform_indices = @transform_14, window_bounds = array<i64: 2, 16>}, {pipeline_mode = #tpu.pipeline_mode<synchronous>, transform_indices = @transform_15, window_bounds = array<i64: 8, 72>}, {pipeline_mode = #tpu.pipeline_mode<synchronous>, transform_indices = @transform_16, window_bounds = array<i64: 8, 2>}, {transform_indices = @transform_17, window_bounds = array<i64: 1, 8, 256>}, {transform_indices = @transform_18, window_bounds = array<i64: 1, 16, 256>}, {transform_indices = @transform_19, window_bounds = array<i64: 1, 8, 256>}]} {
    %c0 = arith.constant 0 : index
    %c0_0 = arith.constant 0 : index
    %c0_1 = arith.constant 0 : index
    %0 = vector.load %arg1[%c0, %c0_0, %c0_1] : memref<1x4x256xf32, #tpu.memory_space<vmem>>, vector<1x4x256xf32>
    %1 = vector.shape_cast %0 : vector<1x4x256xf32> to vector<4x256xf32>
    %c0_2 = arith.constant 0 : index
    %c0_3 = arith.constant 0 : index
    %2 = vector.load %arg2[%c0_2, %c0_3] : memref<9x256xf32, #tpu.memory_space<vmem>>, vector<9x256xf32>
    %c0_4 = arith.constant 0 : index
    %3 = memref.load %arg3[%c0_4] : memref<12xf32, #tpu.memory_space<smem>>
    %c1 = arith.constant 1 : index
    %4 = memref.load %arg3[%c1] : memref<12xf32, #tpu.memory_space<smem>>
    %c0_5 = arith.constant 0 : index
    %c0_6 = arith.constant 0 : index
    %5 = vector.load %arg4[%c0_5, %c0_6] : memref<8x4xf32, #tpu.memory_space<vmem>>, vector<8x4xf32>
    %cst = arith.constant dense<0.000000e+00> : vector<8x256xf32>
    %6 = tpu.matmul %5, %1, %cst {dimension_numbers = #tpu.dot_dimension_numbers<[1], [0], [0], [1], [0, 0, 1, 1], [], []>} : vector<8x4xf32>, vector<4x256xf32>, vector<8x256xf32> -> vector<8x256xf32>
    %c0_7 = arith.constant 0 : index
    %c0_8 = arith.constant 0 : index
    %7 = vector.load %arg5[%c0_7, %c0_8] : memref<8x2xf32, #tpu.memory_space<vmem>>, vector<8x2xf32>
    %8 = vector.extract_strided_slice %7 {offsets = [0, 0], sizes = [8, 1], strides = [1, 1]} : vector<8x2xf32> to vector<8x1xf32>
    %9 = vector.extract_strided_slice %7 {offsets = [0, 1], sizes = [8, 1], strides = [1, 1]} : vector<8x2xf32> to vector<8x1xf32>
    %cst_9 = arith.constant dense<0.000000e+00> : vector<8xf32>
    %10 = vector.multi_reduction <add>, %6, %cst_9 [1] : vector<8x256xf32> to vector<8xf32>
    %11 = vector.shape_cast %10 : vector<8xf32> to vector<8x1xf32>
    %cst_10 = arith.constant 2.560000e+02 : f32
    %12 = vector.broadcast %cst_10 : f32 to vector<8x1xf32>
    %13 = arith.divf %11, %12 : vector<8x1xf32>
    %14 = arith.mulf %6, %6 : vector<8x256xf32>
    %cst_11 = arith.constant dense<0.000000e+00> : vector<8xf32>
    %15 = vector.multi_reduction <add>, %14, %cst_11 [1] : vector<8x256xf32> to vector<8xf32>
    %16 = vector.shape_cast %15 : vector<8xf32> to vector<8x1xf32>
    %cst_12 = arith.constant 2.560000e+02 : f32
    %17 = vector.broadcast %cst_12 : f32 to vector<8x1xf32>
    %18 = arith.divf %16, %17 : vector<8x1xf32>
    %19 = arith.mulf %13, %13 : vector<8x1xf32>
    %20 = arith.subf %18, %19 : vector<8x1xf32>
    %cst_13 = arith.constant 0.000000e+00 : f32
    %21 = vector.broadcast %cst_13 : f32 to vector<8x1xf32>
    %22 = arith.maximumf %20, %21 : vector<8x1xf32>
    %23 = vector.broadcast %13 : vector<8x1xf32> to vector<8x256xf32>
    %24 = arith.subf %6, %23 : vector<8x256xf32>
    %cst_14 = arith.constant 9.99999974E-6 : f32
    %25 = vector.broadcast %cst_14 : f32 to vector<8x1xf32>
    %26 = arith.addf %22, %25 : vector<8x1xf32>
    %27 = math.rsqrt %26 : vector<8x1xf32>
    %28 = vector.broadcast %27 : vector<8x1xf32> to vector<8x256xf32>
    %29 = arith.mulf %24, %28 : vector<8x256xf32>
    %30 = vector.broadcast %8 : vector<8x1xf32> to vector<8x256xf32>
    %31 = arith.mulf %29, %30 : vector<8x256xf32>
    %32 = vector.broadcast %9 : vector<8x1xf32> to vector<8x256xf32>
    %33 = arith.addf %31, %32 : vector<8x256xf32>
    %cst_15 = arith.constant 0.000000e+00 : f32
    %34 = vector.broadcast %cst_15 : f32 to vector<8x256xf32>
    %35 = arith.cmpf oge, %33, %34 : vector<8x256xf32>
    %36 = vector.broadcast %3 : f32 to vector<8x256xf32>
    %37 = arith.mulf %36, %33 : vector<8x256xf32>
    %38 = arith.select %35, %33, %37 : vector<8x256xi1>, vector<8x256xf32>
    %c0_16 = arith.constant 0 : index
    %c0_17 = arith.constant 0 : index
    %39 = vector.load %arg6[%c0_16, %c0_17] : memref<8x72xf32, #tpu.memory_space<vmem>>, vector<8x72xf32>
    %c17_i32 = arith.constant 17 : i32
    %40 = tpu.dynamic_rotate %38 by %c17_i32 dim 1 : vector<8x256xf32>, i32 -> vector<8x256xf32>
    %41 = vector.extract_strided_slice %2 {offsets = [0, 0], sizes = [1, 256], strides = [1, 1]} : vector<9x256xf32> to vector<1x256xf32>
    %42 = vector.broadcast %41 : vector<1x256xf32> to vector<8x256xf32>
    %43 = arith.mulf %40, %42 : vector<8x256xf32>
    %44 = vector.extract_strided_slice %39 {offsets = [0, 0], sizes = [8, 8], strides = [1, 1]} : vector<8x72xf32> to vector<8x8xf32>
    %cst_18 = arith.constant dense<0.000000e+00> : vector<8x256xf32>
    %45 = tpu.matmul %44, %43, %cst_18 {dimension_numbers = #tpu.dot_dimension_numbers<[1], [0], [0], [1], [0, 0, 1, 1], [], []>} : vector<8x8xf32>, vector<8x256xf32>, vector<8x256xf32> -> vector<8x256xf32>
    %c16_i32 = arith.constant 16 : i32
    %46 = tpu.dynamic_rotate %38 by %c16_i32 dim 1 : vector<8x256xf32>, i32 -> vector<8x256xf32>
    %47 = vector.extract_strided_slice %2 {offsets = [1, 0], sizes = [1, 256], strides = [1, 1]} : vector<9x256xf32> to vector<1x256xf32>
    %48 = vector.broadcast %47 : vector<1x256xf32> to vector<8x256xf32>
    %49 = arith.mulf %46, %48 : vector<8x256xf32>
    %50 = vector.extract_strided_slice %39 {offsets = [0, 8], sizes = [8, 8], strides = [1, 1]} : vector<8x72xf32> to vector<8x8xf32>
    %cst_19 = arith.constant dense<0.000000e+00> : vector<8x256xf32>
    %51 = tpu.matmul %50, %49, %cst_19 {dimension_numbers = #tpu.dot_dimension_numbers<[1], [0], [0], [1], [0, 0, 1, 1], [], []>} : vector<8x8xf32>, vector<8x256xf32>, vector<8x256xf32> -> vector<8x256xf32>
    %52 = arith.addf %45, %51 : vector<8x256xf32>
    %c15_i32 = arith.constant 15 : i32
    %53 = tpu.dynamic_rotate %38 by %c15_i32 dim 1 : vector<8x256xf32>, i32 -> vector<8x256xf32>
    %54 = vector.extract_strided_slice %2 {offsets = [2, 0], sizes = [1, 256], strides = [1, 1]} : vector<9x256xf32> to vector<1x256xf32>
    %55 = vector.broadcast %54 : vector<1x256xf32> to vector<8x256xf32>
    %56 = arith.mulf %53, %55 : vector<8x256xf32>
    %57 = vector.extract_strided_slice %39 {offsets = [0, 16], sizes = [8, 8], strides = [1, 1]} : vector<8x72xf32> to vector<8x8xf32>
    %cst_20 = arith.constant dense<0.000000e+00> : vector<8x256xf32>
    %58 = tpu.matmul %57, %56, %cst_20 {dimension_numbers = #tpu.dot_dimension_numbers<[1], [0], [0], [1], [0, 0, 1, 1], [], []>} : vector<8x8xf32>, vector<8x256xf32>, vector<8x256xf32> -> vector<8x256xf32>
    %59 = arith.addf %52, %58 : vector<8x256xf32>
    %c1_i32 = arith.constant 1 : i32
    %60 = tpu.dynamic_rotate %38 by %c1_i32 dim 1 : vector<8x256xf32>, i32 -> vector<8x256xf32>
    %61 = vector.extract_strided_slice %2 {offsets = [3, 0], sizes = [1, 256], strides = [1, 1]} : vector<9x256xf32> to vector<1x256xf32>
    %62 = vector.broadcast %61 : vector<1x256xf32> to vector<8x256xf32>
    %63 = arith.mulf %60, %62 : vector<8x256xf32>
    %64 = vector.extract_strided_slice %39 {offsets = [0, 24], sizes = [8, 8], strides = [1, 1]} : vector<8x72xf32> to vector<8x8xf32>
    %cst_21 = arith.constant dense<0.000000e+00> : vector<8x256xf32>
    %65 = tpu.matmul %64, %63, %cst_21 {dimension_numbers = #tpu.dot_dimension_numbers<[1], [0], [0], [1], [0, 0, 1, 1], [], []>} : vector<8x8xf32>, vector<8x256xf32>, vector<8x256xf32> -> vector<8x256xf32>
    %66 = arith.addf %59, %65 : vector<8x256xf32>
    %67 = vector.extract_strided_slice %39 {offsets = [0, 32], sizes = [8, 8], strides = [1, 1]} : vector<8x72xf32> to vector<8x8xf32>
    %cst_22 = arith.constant dense<0.000000e+00> : vector<8x256xf32>
    %68 = tpu.matmul %67, %38, %cst_22 {dimension_numbers = #tpu.dot_dimension_numbers<[1], [0], [0], [1], [0, 0, 1, 1], [], []>} : vector<8x8xf32>, vector<8x256xf32>, vector<8x256xf32> -> vector<8x256xf32>
    %69 = arith.addf %66, %68 : vector<8x256xf32>
    %c255_i32 = arith.constant 255 : i32
    %70 = tpu.dynamic_rotate %38 by %c255_i32 dim 1 : vector<8x256xf32>, i32 -> vector<8x256xf32>
    %71 = vector.extract_strided_slice %2 {offsets = [5, 0], sizes = [1, 256], strides = [1, 1]} : vector<9x256xf32> to vector<1x256xf32>
    %72 = vector.broadcast %71 : vector<1x256xf32> to vector<8x256xf32>
    %73 = arith.mulf %70, %72 : vector<8x256xf32>
    %74 = vector.extract_strided_slice %39 {offsets = [0, 40], sizes = [8, 8], strides = [1, 1]} : vector<8x72xf32> to vector<8x8xf32>
    %cst_23 = arith.constant dense<0.000000e+00> : vector<8x256xf32>
    %75 = tpu.matmul %74, %73, %cst_23 {dimension_numbers = #tpu.dot_dimension_numbers<[1], [0], [0], [1], [0, 0, 1, 1], [], []>} : vector<8x8xf32>, vector<8x256xf32>, vector<8x256xf32> -> vector<8x256xf32>
    %76 = arith.addf %69, %75 : vector<8x256xf32>
    %c241_i32 = arith.constant 241 : i32
    %77 = tpu.dynamic_rotate %38 by %c241_i32 dim 1 : vector<8x256xf32>, i32 -> vector<8x256xf32>
    %78 = vector.extract_strided_slice %2 {offsets = [6, 0], sizes = [1, 256], strides = [1, 1]} : vector<9x256xf32> to vector<1x256xf32>
    %79 = vector.broadcast %78 : vector<1x256xf32> to vector<8x256xf32>
    %80 = arith.mulf %77, %79 : vector<8x256xf32>
    %81 = vector.extract_strided_slice %39 {offsets = [0, 48], sizes = [8, 8], strides = [1, 1]} : vector<8x72xf32> to vector<8x8xf32>
    %cst_24 = arith.constant dense<0.000000e+00> : vector<8x256xf32>
    %82 = tpu.matmul %81, %80, %cst_24 {dimension_numbers = #tpu.dot_dimension_numbers<[1], [0], [0], [1], [0, 0, 1, 1], [], []>} : vector<8x8xf32>, vector<8x256xf32>, vector<8x256xf32> -> vector<8x256xf32>
    %83 = arith.addf %76, %82 : vector<8x256xf32>
    %c240_i32 = arith.constant 240 : i32
    %84 = tpu.dynamic_rotate %38 by %c240_i32 dim 1 : vector<8x256xf32>, i32 -> vector<8x256xf32>
    %85 = vector.extract_strided_slice %2 {offsets = [7, 0], sizes = [1, 256], strides = [1, 1]} : vector<9x256xf32> to vector<1x256xf32>
    %86 = vector.broadcast %85 : vector<1x256xf32> to vector<8x256xf32>
    %87 = arith.mulf %84, %86 : vector<8x256xf32>
    %88 = vector.extract_strided_slice %39 {offsets = [0, 56], sizes = [8, 8], strides = [1, 1]} : vector<8x72xf32> to vector<8x8xf32>
    %cst_25 = arith.constant dense<0.000000e+00> : vector<8x256xf32>
    %89 = tpu.matmul %88, %87, %cst_25 {dimension_numbers = #tpu.dot_dimension_numbers<[1], [0], [0], [1], [0, 0, 1, 1], [], []>} : vector<8x8xf32>, vector<8x256xf32>, vector<8x256xf32> -> vector<8x256xf32>
    %90 = arith.addf %83, %89 : vector<8x256xf32>
    %c239_i32 = arith.constant 239 : i32
    %91 = tpu.dynamic_rotate %38 by %c239_i32 dim 1 : vector<8x256xf32>, i32 -> vector<8x256xf32>
    %92 = vector.extract_strided_slice %2 {offsets = [8, 0], sizes = [1, 256], strides = [1, 1]} : vector<9x256xf32> to vector<1x256xf32>
    %93 = vector.broadcast %92 : vector<1x256xf32> to vector<8x256xf32>
    %94 = arith.mulf %91, %93 : vector<8x256xf32>
    %95 = vector.extract_strided_slice %39 {offsets = [0, 64], sizes = [8, 8], strides = [1, 1]} : vector<8x72xf32> to vector<8x8xf32>
    %cst_26 = arith.constant dense<0.000000e+00> : vector<8x256xf32>
    %96 = tpu.matmul %95, %94, %cst_26 {dimension_numbers = #tpu.dot_dimension_numbers<[1], [0], [0], [1], [0, 0, 1, 1], [], []>} : vector<8x8xf32>, vector<8x256xf32>, vector<8x256xf32> -> vector<8x256xf32>
    %97 = arith.addf %90, %96 : vector<8x256xf32>
    %c0_27 = arith.constant 0 : index
    %c0_28 = arith.constant 0 : index
    %98 = vector.load %arg7[%c0_27, %c0_28] : memref<8x2xf32, #tpu.memory_space<vmem>>, vector<8x2xf32>
    %99 = vector.extract_strided_slice %98 {offsets = [0, 0], sizes = [8, 1], strides = [1, 1]} : vector<8x2xf32> to vector<8x1xf32>
    %100 = vector.extract_strided_slice %98 {offsets = [0, 1], sizes = [8, 1], strides = [1, 1]} : vector<8x2xf32> to vector<8x1xf32>
    %cst_29 = arith.constant dense<0.000000e+00> : vector<8xf32>
    %101 = vector.multi_reduction <add>, %97, %cst_29 [1] : vector<8x256xf32> to vector<8xf32>
    %102 = vector.shape_cast %101 : vector<8xf32> to vector<8x1xf32>
    %cst_30 = arith.constant 2.560000e+02 : f32
    %103 = vector.broadcast %cst_30 : f32 to vector<8x1xf32>
    %104 = arith.divf %102, %103 : vector<8x1xf32>
    %105 = arith.mulf %97, %97 : vector<8x256xf32>
    %cst_31 = arith.constant dense<0.000000e+00> : vector<8xf32>
    %106 = vector.multi_reduction <add>, %105, %cst_31 [1] : vector<8x256xf32> to vector<8xf32>
    %107 = vector.shape_cast %106 : vector<8xf32> to vector<8x1xf32>
    %cst_32 = arith.constant 2.560000e+02 : f32
    %108 = vector.broadcast %cst_32 : f32 to vector<8x1xf32>
    %109 = arith.divf %107, %108 : vector<8x1xf32>
    %110 = arith.mulf %104, %104 : vector<8x1xf32>
    %111 = arith.subf %109, %110 : vector<8x1xf32>
    %cst_33 = arith.constant 0.000000e+00 : f32
    %112 = vector.broadcast %cst_33 : f32 to vector<8x1xf32>
    %113 = arith.maximumf %111, %112 : vector<8x1xf32>
    %114 = vector.broadcast %104 : vector<8x1xf32> to vector<8x256xf32>
    %115 = arith.subf %97, %114 : vector<8x256xf32>
    %cst_34 = arith.constant 9.99999974E-6 : f32
    %116 = vector.broadcast %cst_34 : f32 to vector<8x1xf32>
    %117 = arith.addf %113, %116 : vector<8x1xf32>
    %118 = math.rsqrt %117 : vector<8x1xf32>
    %119 = vector.broadcast %118 : vector<8x1xf32> to vector<8x256xf32>
    %120 = arith.mulf %115, %119 : vector<8x256xf32>
    %121 = vector.broadcast %99 : vector<8x1xf32> to vector<8x256xf32>
    %122 = arith.mulf %120, %121 : vector<8x256xf32>
    %123 = vector.broadcast %100 : vector<8x1xf32> to vector<8x256xf32>
    %124 = arith.addf %122, %123 : vector<8x256xf32>
    %cst_35 = arith.constant 0.000000e+00 : f32
    %125 = vector.broadcast %cst_35 : f32 to vector<8x256xf32>
    %126 = arith.cmpf oge, %124, %125 : vector<8x256xf32>
    %127 = vector.broadcast %4 : f32 to vector<8x256xf32>
    %128 = arith.mulf %127, %124 : vector<8x256xf32>
    %129 = arith.select %126, %124, %128 : vector<8x256xi1>, vector<8x256xf32>
    %c0_36 = arith.constant 0 : index
    %c0_37 = arith.constant 0 : index
    %c0_38 = arith.constant 0 : index
    %130 = vector.load %arg18[%c0_36, %c0_37, %c0_38] : memref<1x8x256xf32, #tpu.memory_space<vmem>>, vector<1x8x256xf32>
    %131 = vector.shape_cast %130 : vector<1x8x256xf32> to vector<8x256xf32>
    %132 = vector.shape_cast %129 : vector<8x256xf32> to vector<1x8x256xf32>
    tpu.vector_store %arg18[%c0_36, %c0_37, %c0_38], %132 {strides = array<i32>} : memref<1x8x256xf32, #tpu.memory_space<vmem>>, vector<1x8x256xf32>,
    %c4 = arith.constant 4 : index
    %133 = memref.load %arg3[%c4] : memref<12xf32, #tpu.memory_space<smem>>
    %c5 = arith.constant 5 : index
    %134 = memref.load %arg3[%c5] : memref<12xf32, #tpu.memory_space<smem>>
    %c0_39 = arith.constant 0 : index
    %c0_40 = arith.constant 0 : index
    %135 = vector.load %arg8[%c0_39, %c0_40] : memref<8x4xf32, #tpu.memory_space<vmem>>, vector<8x4xf32>
    %cst_41 = arith.constant dense<0.000000e+00> : vector<8x256xf32>
    %136 = tpu.matmul %135, %1, %cst_41 {dimension_numbers = #tpu.dot_dimension_numbers<[1], [0], [0], [1], [0, 0, 1, 1], [], []>} : vector<8x4xf32>, vector<4x256xf32>, vector<8x256xf32> -> vector<8x256xf32>
    %c0_42 = arith.constant 0 : index
    %c0_43 = arith.constant 0 : index
    %137 = vector.load %arg9[%c0_42, %c0_43] : memref<8x2xf32, #tpu.memory_space<vmem>>, vector<8x2xf32>
    %138 = vector.extract_strided_slice %137 {offsets = [0, 0], sizes = [8, 1], strides = [1, 1]} : vector<8x2xf32> to vector<8x1xf32>
    %139 = vector.extract_strided_slice %137 {offsets = [0, 1], sizes = [8, 1], strides = [1, 1]} : vector<8x2xf32> to vector<8x1xf32>
    %cst_44 = arith.constant dense<0.000000e+00> : vector<8xf32>
    %140 = vector.multi_reduction <add>, %136, %cst_44 [1] : vector<8x256xf32> to vector<8xf32>
    %141 = vector.shape_cast %140 : vector<8xf32> to vector<8x1xf32>
    %cst_45 = arith.constant 2.560000e+02 : f32
    %142 = vector.broadcast %cst_45 : f32 to vector<8x1xf32>
    %143 = arith.divf %141, %142 : vector<8x1xf32>
    %144 = arith.mulf %136, %136 : vector<8x256xf32>
    %cst_46 = arith.constant dense<0.000000e+00> : vector<8xf32>
    %145 = vector.multi_reduction <add>, %144, %cst_46 [1] : vector<8x256xf32> to vector<8xf32>
    %146 = vector.shape_cast %145 : vector<8xf32> to vector<8x1xf32>
    %cst_47 = arith.constant 2.560000e+02 : f32
    %147 = vector.broadcast %cst_47 : f32 to vector<8x1xf32>
    %148 = arith.divf %146, %147 : vector<8x1xf32>
    %149 = arith.mulf %143, %143 : vector<8x1xf32>
    %150 = arith.subf %148, %149 : vector<8x1xf32>
    %cst_48 = arith.constant 0.000000e+00 : f32
    %151 = vector.broadcast %cst_48 : f32 to vector<8x1xf32>
    %152 = arith.maximumf %150, %151 : vector<8x1xf32>
    %153 = vector.broadcast %143 : vector<8x1xf32> to vector<8x256xf32>
    %154 = arith.subf %136, %153 : vector<8x256xf32>
    %cst_49 = arith.constant 9.99999974E-6 : f32
    %155 = vector.broadcast %cst_49 : f32 to vector<8x1xf32>
    %156 = arith.addf %152, %155 : vector<8x1xf32>
    %157 = math.rsqrt %156 : vector<8x1xf32>
    %158 = vector.broadcast %157 : vector<8x1xf32> to vector<8x256xf32>
    %159 = arith.mulf %154, %158 : vector<8x256xf32>
    %160 = vector.broadcast %138 : vector<8x1xf32> to vector<8x256xf32>
    %161 = arith.mulf %159, %160 : vector<8x256xf32>
    %162 = vector.broadcast %139 : vector<8x1xf32> to vector<8x256xf32>
    %163 = arith.addf %161, %162 : vector<8x256xf32>
    %cst_50 = arith.constant 0.000000e+00 : f32
    %164 = vector.broadcast %cst_50 : f32 to vector<8x256xf32>
    %165 = arith.cmpf oge, %163, %164 : vector<8x256xf32>
    %166 = vector.broadcast %133 : f32 to vector<8x256xf32>
    %167 = arith.mulf %166, %163 : vector<8x256xf32>
    %168 = arith.select %165, %163, %167 : vector<8x256xi1>, vector<8x256xf32>
    %c0_51 = arith.constant 0 : index
    %c0_52 = arith.constant 0 : index
    %169 = vector.load %arg10[%c0_51, %c0_52] : memref<2x16xf32, #tpu.memory_space<vmem>>, vector<2x16xf32>
    %170 = vector.extract_strided_slice %169 {offsets = [0, 0], sizes = [2, 8], strides = [1, 1]} : vector<2x16xf32> to vector<2x8xf32>
    %cst_53 = arith.constant dense<0.000000e+00> : vector<2x256xf32>
    %171 = tpu.matmul %170, %168, %cst_53 {dimension_numbers = #tpu.dot_dimension_numbers<[1], [0], [0], [1], [0, 0, 1, 1], [], []>} : vector<2x8xf32>, vector<8x256xf32>, vector<2x256xf32> -> vector<2x256xf32>
    %172 = vector.extract_strided_slice %169 {offsets = [0, 8], sizes = [2, 8], strides = [1, 1]} : vector<2x16xf32> to vector<2x8xf32>
    %cst_54 = arith.constant dense<0.000000e+00> : vector<2x256xf32>
    %173 = tpu.matmul %172, %38, %cst_54 {dimension_numbers = #tpu.dot_dimension_numbers<[1], [0], [0], [1], [0, 0, 1, 1], [], []>} : vector<2x8xf32>, vector<8x256xf32>, vector<2x256xf32> -> vector<2x256xf32>
    %174 = arith.addf %171, %173 : vector<2x256xf32>
    %175 = vector.extract_strided_slice %174 {offsets = [0, 0], sizes = [1, 256], strides = [1, 1]} : vector<2x256xf32> to vector<1x256xf32>
    %c6 = arith.constant 6 : index
    %176 = memref.load %arg3[%c6] : memref<12xf32, #tpu.memory_space<smem>>
    %177 = vector.broadcast %176 : f32 to vector<1x256xf32>
    %178 = arith.addf %175, %177 : vector<1x256xf32>
    %179 = arith.negf %178 : vector<1x256xf32>
    %180 = math.exp %179 : vector<1x256xf32>
    %cst_55 = arith.constant 1.000000e+00 : f32
    %181 = vector.broadcast %cst_55 : f32 to vector<1x256xf32>
    %182 = arith.addf %181, %180 : vector<1x256xf32>
    %183 = arith.divf %181, %182 : vector<1x256xf32>
    %184 = vector.extract_strided_slice %174 {offsets = [1, 0], sizes = [1, 256], strides = [1, 1]} : vector<2x256xf32> to vector<1x256xf32>
    %c7 = arith.constant 7 : index
    %185 = memref.load %arg3[%c7] : memref<12xf32, #tpu.memory_space<smem>>
    %186 = vector.broadcast %185 : f32 to vector<1x256xf32>
    %187 = arith.addf %184, %186 : vector<1x256xf32>
    %188 = arith.negf %187 : vector<1x256xf32>
    %189 = math.exp %188 : vector<1x256xf32>
    %cst_56 = arith.constant 1.000000e+00 : f32
    %190 = vector.broadcast %cst_56 : f32 to vector<1x256xf32>
    %191 = arith.addf %190, %189 : vector<1x256xf32>
    %192 = arith.divf %190, %191 : vector<1x256xf32>
    %193 = vector.broadcast %183 : vector<1x256xf32> to vector<8x256xf32>
    %194 = arith.mulf %168, %193 : vector<8x256xf32>
    %195 = vector.broadcast %192 : vector<1x256xf32> to vector<8x256xf32>
    %196 = arith.mulf %38, %195 : vector<8x256xf32>
    %197 = arith.addf %194, %196 : vector<8x256xf32>
    %c0_57 = arith.constant 0 : index
    %c0_58 = arith.constant 0 : index
    %198 = vector.load %arg11[%c0_57, %c0_58] : memref<16x72xf32, #tpu.memory_space<vmem>>, vector<16x72xf32>
    %c17_i32_59 = arith.constant 17 : i32
    %199 = tpu.dynamic_rotate %197 by %c17_i32_59 dim 1 : vector<8x256xf32>, i32 -> vector<8x256xf32>
    %200 = vector.extract_strided_slice %2 {offsets = [0, 0], sizes = [1, 256], strides = [1, 1]} : vector<9x256xf32> to vector<1x256xf32>
    %201 = vector.broadcast %200 : vector<1x256xf32> to vector<8x256xf32>
    %202 = arith.mulf %199, %201 : vector<8x256xf32>
    %203 = vector.extract_strided_slice %198 {offsets = [0, 0], sizes = [16, 8], strides = [1, 1]} : vector<16x72xf32> to vector<16x8xf32>
    %cst_60 = arith.constant dense<0.000000e+00> : vector<16x256xf32>
    %204 = tpu.matmul %203, %202, %cst_60 {dimension_numbers = #tpu.dot_dimension_numbers<[1], [0], [0], [1], [0, 0, 1, 1], [], []>} : vector<16x8xf32>, vector<8x256xf32>, vector<16x256xf32> -> vector<16x256xf32>
    %c16_i32_61 = arith.constant 16 : i32
    %205 = tpu.dynamic_rotate %197 by %c16_i32_61 dim 1 : vector<8x256xf32>, i32 -> vector<8x256xf32>
    %206 = vector.extract_strided_slice %2 {offsets = [1, 0], sizes = [1, 256], strides = [1, 1]} : vector<9x256xf32> to vector<1x256xf32>
    %207 = vector.broadcast %206 : vector<1x256xf32> to vector<8x256xf32>
    %208 = arith.mulf %205, %207 : vector<8x256xf32>
    %209 = vector.extract_strided_slice %198 {offsets = [0, 8], sizes = [16, 8], strides = [1, 1]} : vector<16x72xf32> to vector<16x8xf32>
    %cst_62 = arith.constant dense<0.000000e+00> : vector<16x256xf32>
    %210 = tpu.matmul %209, %208, %cst_62 {dimension_numbers = #tpu.dot_dimension_numbers<[1], [0], [0], [1], [0, 0, 1, 1], [], []>} : vector<16x8xf32>, vector<8x256xf32>, vector<16x256xf32> -> vector<16x256xf32>
    %211 = arith.addf %204, %210 : vector<16x256xf32>
    %c15_i32_63 = arith.constant 15 : i32
    %212 = tpu.dynamic_rotate %197 by %c15_i32_63 dim 1 : vector<8x256xf32>, i32 -> vector<8x256xf32>
    %213 = vector.extract_strided_slice %2 {offsets = [2, 0], sizes = [1, 256], strides = [1, 1]} : vector<9x256xf32> to vector<1x256xf32>
    %214 = vector.broadcast %213 : vector<1x256xf32> to vector<8x256xf32>
    %215 = arith.mulf %212, %214 : vector<8x256xf32>
    %216 = vector.extract_strided_slice %198 {offsets = [0, 16], sizes = [16, 8], strides = [1, 1]} : vector<16x72xf32> to vector<16x8xf32>
    %cst_64 = arith.constant dense<0.000000e+00> : vector<16x256xf32>
    %217 = tpu.matmul %216, %215, %cst_64 {dimension_numbers = #tpu.dot_dimension_numbers<[1], [0], [0], [1], [0, 0, 1, 1], [], []>} : vector<16x8xf32>, vector<8x256xf32>, vector<16x256xf32> -> vector<16x256xf32>
    %218 = arith.addf %211, %217 : vector<16x256xf32>
    %c1_i32_65 = arith.constant 1 : i32
    %219 = tpu.dynamic_rotate %197 by %c1_i32_65 dim 1 : vector<8x256xf32>, i32 -> vector<8x256xf32>
    %220 = vector.extract_strided_slice %2 {offsets = [3, 0], sizes = [1, 256], strides = [1, 1]} : vector<9x256xf32> to vector<1x256xf32>
    %221 = vector.broadcast %220 : vector<1x256xf32> to vector<8x256xf32>
    %222 = arith.mulf %219, %221 : vector<8x256xf32>
    %223 = vector.extract_strided_slice %198 {offsets = [0, 24], sizes = [16, 8], strides = [1, 1]} : vector<16x72xf32> to vector<16x8xf32>
    %cst_66 = arith.constant dense<0.000000e+00> : vector<16x256xf32>
    %224 = tpu.matmul %223, %222, %cst_66 {dimension_numbers = #tpu.dot_dimension_numbers<[1], [0], [0], [1], [0, 0, 1, 1], [], []>} : vector<16x8xf32>, vector<8x256xf32>, vector<16x256xf32> -> vector<16x256xf32>
    %225 = arith.addf %218, %224 : vector<16x256xf32>
    %226 = vector.extract_strided_slice %198 {offsets = [0, 32], sizes = [16, 8], strides = [1, 1]} : vector<16x72xf32> to vector<16x8xf32>
    %cst_67 = arith.constant dense<0.000000e+00> : vector<16x256xf32>
    %227 = tpu.matmul %226, %197, %cst_67 {dimension_numbers = #tpu.dot_dimension_numbers<[1], [0], [0], [1], [0, 0, 1, 1], [], []>} : vector<16x8xf32>, vector<8x256xf32>, vector<16x256xf32> -> vector<16x256xf32>
    %228 = arith.addf %225, %227 : vector<16x256xf32>
    %c255_i32_68 = arith.constant 255 : i32
    %229 = tpu.dynamic_rotate %197 by %c255_i32_68 dim 1 : vector<8x256xf32>, i32 -> vector<8x256xf32>
    %230 = vector.extract_strided_slice %2 {offsets = [5, 0], sizes = [1, 256], strides = [1, 1]} : vector<9x256xf32> to vector<1x256xf32>
    %231 = vector.broadcast %230 : vector<1x256xf32> to vector<8x256xf32>
    %232 = arith.mulf %229, %231 : vector<8x256xf32>
    %233 = vector.extract_strided_slice %198 {offsets = [0, 40], sizes = [16, 8], strides = [1, 1]} : vector<16x72xf32> to vector<16x8xf32>
    %cst_69 = arith.constant dense<0.000000e+00> : vector<16x256xf32>
    %234 = tpu.matmul %233, %232, %cst_69 {dimension_numbers = #tpu.dot_dimension_numbers<[1], [0], [0], [1], [0, 0, 1, 1], [], []>} : vector<16x8xf32>, vector<8x256xf32>, vector<16x256xf32> -> vector<16x256xf32>
    %235 = arith.addf %228, %234 : vector<16x256xf32>
    %c241_i32_70 = arith.constant 241 : i32
    %236 = tpu.dynamic_rotate %197 by %c241_i32_70 dim 1 : vector<8x256xf32>, i32 -> vector<8x256xf32>
    %237 = vector.extract_strided_slice %2 {offsets = [6, 0], sizes = [1, 256], strides = [1, 1]} : vector<9x256xf32> to vector<1x256xf32>
    %238 = vector.broadcast %237 : vector<1x256xf32> to vector<8x256xf32>
    %239 = arith.mulf %236, %238 : vector<8x256xf32>
    %240 = vector.extract_strided_slice %198 {offsets = [0, 48], sizes = [16, 8], strides = [1, 1]} : vector<16x72xf32> to vector<16x8xf32>
    %cst_71 = arith.constant dense<0.000000e+00> : vector<16x256xf32>
    %241 = tpu.matmul %240, %239, %cst_71 {dimension_numbers = #tpu.dot_dimension_numbers<[1], [0], [0], [1], [0, 0, 1, 1], [], []>} : vector<16x8xf32>, vector<8x256xf32>, vector<16x256xf32> -> vector<16x256xf32>
    %242 = arith.addf %235, %241 : vector<16x256xf32>
    %c240_i32_72 = arith.constant 240 : i32
    %243 = tpu.dynamic_rotate %197 by %c240_i32_72 dim 1 : vector<8x256xf32>, i32 -> vector<8x256xf32>
    %244 = vector.extract_strided_slice %2 {offsets = [7, 0], sizes = [1, 256], strides = [1, 1]} : vector<9x256xf32> to vector<1x256xf32>
    %245 = vector.broadcast %244 : vector<1x256xf32> to vector<8x256xf32>
    %246 = arith.mulf %243, %245 : vector<8x256xf32>
    %247 = vector.extract_strided_slice %198 {offsets = [0, 56], sizes = [16, 8], strides = [1, 1]} : vector<16x72xf32> to vector<16x8xf32>
    %cst_73 = arith.constant dense<0.000000e+00> : vector<16x256xf32>
    %248 = tpu.matmul %247, %246, %cst_73 {dimension_numbers = #tpu.dot_dimension_numbers<[1], [0], [0], [1], [0, 0, 1, 1], [], []>} : vector<16x8xf32>, vector<8x256xf32>, vector<16x256xf32> -> vector<16x256xf32>
    %249 = arith.addf %242, %248 : vector<16x256xf32>
    %c239_i32_74 = arith.constant 239 : i32
    %250 = tpu.dynamic_rotate %197 by %c239_i32_74 dim 1 : vector<8x256xf32>, i32 -> vector<8x256xf32>
    %251 = vector.extract_strided_slice %2 {offsets = [8, 0], sizes = [1, 256], strides = [1, 1]} : vector<9x256xf32> to vector<1x256xf32>
    %252 = vector.broadcast %251 : vector<1x256xf32> to vector<8x256xf32>
    %253 = arith.mulf %250, %252 : vector<8x256xf32>
    %254 = vector.extract_strided_slice %198 {offsets = [0, 64], sizes = [16, 8], strides = [1, 1]} : vector<16x72xf32> to vector<16x8xf32>
    %cst_75 = arith.constant dense<0.000000e+00> : vector<16x256xf32>
    %255 = tpu.matmul %254, %253, %cst_75 {dimension_numbers = #tpu.dot_dimension_numbers<[1], [0], [0], [1], [0, 0, 1, 1], [], []>} : vector<16x8xf32>, vector<8x256xf32>, vector<16x256xf32> -> vector<16x256xf32>
    %256 = arith.addf %249, %255 : vector<16x256xf32>
    %c0_76 = arith.constant 0 : index
    %c0_77 = arith.constant 0 : index
    %257 = vector.load %arg12[%c0_76, %c0_77] : memref<16x2xf32, #tpu.memory_space<vmem>>, vector<16x2xf32>
    %258 = vector.extract_strided_slice %257 {offsets = [0, 0], sizes = [16, 1], strides = [1, 1]} : vector<16x2xf32> to vector<16x1xf32>
    %259 = vector.extract_strided_slice %257 {offsets = [0, 1], sizes = [16, 1], strides = [1, 1]} : vector<16x2xf32> to vector<16x1xf32>
    %cst_78 = arith.constant dense<0.000000e+00> : vector<16xf32>
    %260 = vector.multi_reduction <add>, %256, %cst_78 [1] : vector<16x256xf32> to vector<16xf32>
    %261 = vector.shape_cast %260 : vector<16xf32> to vector<16x1xf32>
    %cst_79 = arith.constant 2.560000e+02 : f32
    %262 = vector.broadcast %cst_79 : f32 to vector<16x1xf32>
    %263 = arith.divf %261, %262 : vector<16x1xf32>
    %264 = arith.mulf %256, %256 : vector<16x256xf32>
    %cst_80 = arith.constant dense<0.000000e+00> : vector<16xf32>
    %265 = vector.multi_reduction <add>, %264, %cst_80 [1] : vector<16x256xf32> to vector<16xf32>
    %266 = vector.shape_cast %265 : vector<16xf32> to vector<16x1xf32>
    %cst_81 = arith.constant 2.560000e+02 : f32
    %267 = vector.broadcast %cst_81 : f32 to vector<16x1xf32>
    %268 = arith.divf %266, %267 : vector<16x1xf32>
    %269 = arith.mulf %263, %263 : vector<16x1xf32>
    %270 = arith.subf %268, %269 : vector<16x1xf32>
    %cst_82 = arith.constant 0.000000e+00 : f32
    %271 = vector.broadcast %cst_82 : f32 to vector<16x1xf32>
    %272 = arith.maximumf %270, %271 : vector<16x1xf32>
    %273 = vector.broadcast %263 : vector<16x1xf32> to vector<16x256xf32>
    %274 = arith.subf %256, %273 : vector<16x256xf32>
    %cst_83 = arith.constant 9.99999974E-6 : f32
    %275 = vector.broadcast %cst_83 : f32 to vector<16x1xf32>
    %276 = arith.addf %272, %275 : vector<16x1xf32>
    %277 = math.rsqrt %276 : vector<16x1xf32>
    %278 = vector.broadcast %277 : vector<16x1xf32> to vector<16x256xf32>
    %279 = arith.mulf %274, %278 : vector<16x256xf32>
    %280 = vector.broadcast %258 : vector<16x1xf32> to vector<16x256xf32>
    %281 = arith.mulf %279, %280 : vector<16x256xf32>
    %282 = vector.broadcast %259 : vector<16x1xf32> to vector<16x256xf32>
    %283 = arith.addf %281, %282 : vector<16x256xf32>
    %cst_84 = arith.constant 0.000000e+00 : f32
    %284 = vector.broadcast %cst_84 : f32 to vector<16x256xf32>
    %285 = arith.cmpf oge, %283, %284 : vector<16x256xf32>
    %286 = vector.broadcast %134 : f32 to vector<16x256xf32>
    %287 = arith.mulf %286, %283 : vector<16x256xf32>
    %288 = arith.select %285, %283, %287 : vector<16x256xi1>, vector<16x256xf32>
    %c0_85 = arith.constant 0 : index
    %c0_86 = arith.constant 0 : index
    %c0_87 = arith.constant 0 : index
    %289 = vector.load %arg19[%c0_85, %c0_86, %c0_87] : memref<1x16x256xf32, #tpu.memory_space<vmem>>, vector<1x16x256xf32>
    %290 = vector.shape_cast %289 : vector<1x16x256xf32> to vector<16x256xf32>
    %291 = vector.shape_cast %288 : vector<16x256xf32> to vector<1x16x256xf32>
    tpu.vector_store %arg19[%c0_85, %c0_86, %c0_87], %291 {strides = array<i32>} : memref<1x16x256xf32, #tpu.memory_space<vmem>>, vector<1x16x256xf32>,
    %c8 = arith.constant 8 : index
    %292 = memref.load %arg3[%c8] : memref<12xf32, #tpu.memory_space<smem>>
    %c9 = arith.constant 9 : index
    %293 = memref.load %arg3[%c9] : memref<12xf32, #tpu.memory_space<smem>>
    %c0_88 = arith.constant 0 : index
    %c0_89 = arith.constant 0 : index
    %294 = vector.load %arg13[%c0_88, %c0_89] : memref<8x4xf32, #tpu.memory_space<vmem>>, vector<8x4xf32>
    %cst_90 = arith.constant dense<0.000000e+00> : vector<8x256xf32>
    %295 = tpu.matmul %294, %1, %cst_90 {dimension_numbers = #tpu.dot_dimension_numbers<[1], [0], [0], [1], [0, 0, 1, 1], [], []>} : vector<8x4xf32>, vector<4x256xf32>, vector<8x256xf32> -> vector<8x256xf32>
    %c0_91 = arith.constant 0 : index
    %c0_92 = arith.constant 0 : index
    %296 = vector.load %arg14[%c0_91, %c0_92] : memref<8x2xf32, #tpu.memory_space<vmem>>, vector<8x2xf32>
    %297 = vector.extract_strided_slice %296 {offsets = [0, 0], sizes = [8, 1], strides = [1, 1]} : vector<8x2xf32> to vector<8x1xf32>
    %298 = vector.extract_strided_slice %296 {offsets = [0, 1], sizes = [8, 1], strides = [1, 1]} : vector<8x2xf32> to vector<8x1xf32>
    %cst_93 = arith.constant dense<0.000000e+00> : vector<8xf32>
    %299 = vector.multi_reduction <add>, %295, %cst_93 [1] : vector<8x256xf32> to vector<8xf32>
    %300 = vector.shape_cast %299 : vector<8xf32> to vector<8x1xf32>
    %cst_94 = arith.constant 2.560000e+02 : f32
    %301 = vector.broadcast %cst_94 : f32 to vector<8x1xf32>
    %302 = arith.divf %300, %301 : vector<8x1xf32>
    %303 = arith.mulf %295, %295 : vector<8x256xf32>
    %cst_95 = arith.constant dense<0.000000e+00> : vector<8xf32>
    %304 = vector.multi_reduction <add>, %303, %cst_95 [1] : vector<8x256xf32> to vector<8xf32>
    %305 = vector.shape_cast %304 : vector<8xf32> to vector<8x1xf32>
    %cst_96 = arith.constant 2.560000e+02 : f32
    %306 = vector.broadcast %cst_96 : f32 to vector<8x1xf32>
    %307 = arith.divf %305, %306 : vector<8x1xf32>
    %308 = arith.mulf %302, %302 : vector<8x1xf32>
    %309 = arith.subf %307, %308 : vector<8x1xf32>
    %cst_97 = arith.constant 0.000000e+00 : f32
    %310 = vector.broadcast %cst_97 : f32 to vector<8x1xf32>
    %311 = arith.maximumf %309, %310 : vector<8x1xf32>
    %312 = vector.broadcast %302 : vector<8x1xf32> to vector<8x256xf32>
    %313 = arith.subf %295, %312 : vector<8x256xf32>
    %cst_98 = arith.constant 9.99999974E-6 : f32
    %314 = vector.broadcast %cst_98 : f32 to vector<8x1xf32>
    %315 = arith.addf %311, %314 : vector<8x1xf32>
    %316 = math.rsqrt %315 : vector<8x1xf32>
    %317 = vector.broadcast %316 : vector<8x1xf32> to vector<8x256xf32>
    %318 = arith.mulf %313, %317 : vector<8x256xf32>
    %319 = vector.broadcast %297 : vector<8x1xf32> to vector<8x256xf32>
    %320 = arith.mulf %318, %319 : vector<8x256xf32>
    %321 = vector.broadcast %298 : vector<8x1xf32> to vector<8x256xf32>
    %322 = arith.addf %320, %321 : vector<8x256xf32>
    %cst_99 = arith.constant 0.000000e+00 : f32
    %323 = vector.broadcast %cst_99 : f32 to vector<8x256xf32>
    %324 = arith.cmpf oge, %322, %323 : vector<8x256xf32>
    %325 = vector.broadcast %292 : f32 to vector<8x256xf32>
    %326 = arith.mulf %325, %322 : vector<8x256xf32>
    %327 = arith.select %324, %322, %326 : vector<8x256xi1>, vector<8x256xf32>
    %c0_100 = arith.constant 0 : index
    %c0_101 = arith.constant 0 : index
    %328 = vector.load %arg15[%c0_100, %c0_101] : memref<2x16xf32, #tpu.memory_space<vmem>>, vector<2x16xf32>
    %329 = vector.extract_strided_slice %328 {offsets = [0, 0], sizes = [2, 8], strides = [1, 1]} : vector<2x16xf32> to vector<2x8xf32>
    %cst_102 = arith.constant dense<0.000000e+00> : vector<2x256xf32>
    %330 = tpu.matmul %329, %327, %cst_102 {dimension_numbers = #tpu.dot_dimension_numbers<[1], [0], [0], [1], [0, 0, 1, 1], [], []>} : vector<2x8xf32>, vector<8x256xf32>, vector<2x256xf32> -> vector<2x256xf32>
    %331 = vector.extract_strided_slice %328 {offsets = [0, 8], sizes = [2, 8], strides = [1, 1]} : vector<2x16xf32> to vector<2x8xf32>
    %cst_103 = arith.constant dense<0.000000e+00> : vector<2x256xf32>
    %332 = tpu.matmul %331, %197, %cst_103 {dimension_numbers = #tpu.dot_dimension_numbers<[1], [0], [0], [1], [0, 0, 1, 1], [], []>} : vector<2x8xf32>, vector<8x256xf32>, vector<2x256xf32> -> vector<2x256xf32>
    %333 = arith.addf %330, %332 : vector<2x256xf32>
    %334 = vector.extract_strided_slice %333 {offsets = [0, 0], sizes = [1, 256], strides = [1, 1]} : vector<2x256xf32> to vector<1x256xf32>
    %c10 = arith.constant 10 : index
    %335 = memref.load %arg3[%c10] : memref<12xf32, #tpu.memory_space<smem>>
    %336 = vector.broadcast %335 : f32 to vector<1x256xf32>
    %337 = arith.addf %334, %336 : vector<1x256xf32>
    %338 = arith.negf %337 : vector<1x256xf32>
    %339 = math.exp %338 : vector<1x256xf32>
    %cst_104 = arith.constant 1.000000e+00 : f32
    %340 = vector.broadcast %cst_104 : f32 to vector<1x256xf32>
    %341 = arith.addf %340, %339 : vector<1x256xf32>
    %342 = arith.divf %340, %341 : vector<1x256xf32>
    %343 = vector.extract_strided_slice %333 {offsets = [1, 0], sizes = [1, 256], strides = [1, 1]} : vector<2x256xf32> to vector<1x256xf32>
    %c11 = arith.constant 11 : index
    %344 = memref.load %arg3[%c11] : memref<12xf32, #tpu.memory_space<smem>>
    %345 = vector.broadcast %344 : f32 to vector<1x256xf32>
    %346 = arith.addf %343, %345 : vector<1x256xf32>
    %347 = arith.negf %346 : vector<1x256xf32>
    %348 = math.exp %347 : vector<1x256xf32>
    %cst_105 = arith.constant 1.000000e+00 : f32
    %349 = vector.broadcast %cst_105 : f32 to vector<1x256xf32>
    %350 = arith.addf %349, %348 : vector<1x256xf32>
    %351 = arith.divf %349, %350 : vector<1x256xf32>
    %352 = vector.broadcast %342 : vector<1x256xf32> to vector<8x256xf32>
    %353 = arith.mulf %327, %352 : vector<8x256xf32>
    %354 = vector.broadcast %351 : vector<1x256xf32> to vector<8x256xf32>
    %355 = arith.mulf %197, %354 : vector<8x256xf32>
    %356 = arith.addf %353, %355 : vector<8x256xf32>
    %c0_106 = arith.constant 0 : index
    %c0_107 = arith.constant 0 : index
    %357 = vector.load %arg16[%c0_106, %c0_107] : memref<8x72xf32, #tpu.memory_space<vmem>>, vector<8x72xf32>
    %c17_i32_108 = arith.constant 17 : i32
    %358 = tpu.dynamic_rotate %356 by %c17_i32_108 dim 1 : vector<8x256xf32>, i32 -> vector<8x256xf32>
    %359 = vector.extract_strided_slice %2 {offsets = [0, 0], sizes = [1, 256], strides = [1, 1]} : vector<9x256xf32> to vector<1x256xf32>
    %360 = vector.broadcast %359 : vector<1x256xf32> to vector<8x256xf32>
    %361 = arith.mulf %358, %360 : vector<8x256xf32>
    %362 = vector.extract_strided_slice %357 {offsets = [0, 0], sizes = [8, 8], strides = [1, 1]} : vector<8x72xf32> to vector<8x8xf32>
    %cst_109 = arith.constant dense<0.000000e+00> : vector<8x256xf32>
    %363 = tpu.matmul %362, %361, %cst_109 {dimension_numbers = #tpu.dot_dimension_numbers<[1], [0], [0], [1], [0, 0, 1, 1], [], []>} : vector<8x8xf32>, vector<8x256xf32>, vector<8x256xf32> -> vector<8x256xf32>
    %c16_i32_110 = arith.constant 16 : i32
    %364 = tpu.dynamic_rotate %356 by %c16_i32_110 dim 1 : vector<8x256xf32>, i32 -> vector<8x256xf32>
    %365 = vector.extract_strided_slice %2 {offsets = [1, 0], sizes = [1, 256], strides = [1, 1]} : vector<9x256xf32> to vector<1x256xf32>
    %366 = vector.broadcast %365 : vector<1x256xf32> to vector<8x256xf32>
    %367 = arith.mulf %364, %366 : vector<8x256xf32>
    %368 = vector.extract_strided_slice %357 {offsets = [0, 8], sizes = [8, 8], strides = [1, 1]} : vector<8x72xf32> to vector<8x8xf32>
    %cst_111 = arith.constant dense<0.000000e+00> : vector<8x256xf32>
    %369 = tpu.matmul %368, %367, %cst_111 {dimension_numbers = #tpu.dot_dimension_numbers<[1], [0], [0], [1], [0, 0, 1, 1], [], []>} : vector<8x8xf32>, vector<8x256xf32>, vector<8x256xf32> -> vector<8x256xf32>
    %370 = arith.addf %363, %369 : vector<8x256xf32>
    %c15_i32_112 = arith.constant 15 : i32
    %371 = tpu.dynamic_rotate %356 by %c15_i32_112 dim 1 : vector<8x256xf32>, i32 -> vector<8x256xf32>
    %372 = vector.extract_strided_slice %2 {offsets = [2, 0], sizes = [1, 256], strides = [1, 1]} : vector<9x256xf32> to vector<1x256xf32>
    %373 = vector.broadcast %372 : vector<1x256xf32> to vector<8x256xf32>
    %374 = arith.mulf %371, %373 : vector<8x256xf32>
    %375 = vector.extract_strided_slice %357 {offsets = [0, 16], sizes = [8, 8], strides = [1, 1]} : vector<8x72xf32> to vector<8x8xf32>
    %cst_113 = arith.constant dense<0.000000e+00> : vector<8x256xf32>
    %376 = tpu.matmul %375, %374, %cst_113 {dimension_numbers = #tpu.dot_dimension_numbers<[1], [0], [0], [1], [0, 0, 1, 1], [], []>} : vector<8x8xf32>, vector<8x256xf32>, vector<8x256xf32> -> vector<8x256xf32>
    %377 = arith.addf %370, %376 : vector<8x256xf32>
    %c1_i32_114 = arith.constant 1 : i32
    %378 = tpu.dynamic_rotate %356 by %c1_i32_114 dim 1 : vector<8x256xf32>, i32 -> vector<8x256xf32>
    %379 = vector.extract_strided_slice %2 {offsets = [3, 0], sizes = [1, 256], strides = [1, 1]} : vector<9x256xf32> to vector<1x256xf32>
    %380 = vector.broadcast %379 : vector<1x256xf32> to vector<8x256xf32>
    %381 = arith.mulf %378, %380 : vector<8x256xf32>
    %382 = vector.extract_strided_slice %357 {offsets = [0, 24], sizes = [8, 8], strides = [1, 1]} : vector<8x72xf32> to vector<8x8xf32>
    %cst_115 = arith.constant dense<0.000000e+00> : vector<8x256xf32>
    %383 = tpu.matmul %382, %381, %cst_115 {dimension_numbers = #tpu.dot_dimension_numbers<[1], [0], [0], [1], [0, 0, 1, 1], [], []>} : vector<8x8xf32>, vector<8x256xf32>, vector<8x256xf32> -> vector<8x256xf32>
    %384 = arith.addf %377, %383 : vector<8x256xf32>
    %385 = vector.extract_strided_slice %357 {offsets = [0, 32], sizes = [8, 8], strides = [1, 1]} : vector<8x72xf32> to vector<8x8xf32>
    %cst_116 = arith.constant dense<0.000000e+00> : vector<8x256xf32>
    %386 = tpu.matmul %385, %356, %cst_116 {dimension_numbers = #tpu.dot_dimension_numbers<[1], [0], [0], [1], [0, 0, 1, 1], [], []>} : vector<8x8xf32>, vector<8x256xf32>, vector<8x256xf32> -> vector<8x256xf32>
    %387 = arith.addf %384, %386 : vector<8x256xf32>
    %c255_i32_117 = arith.constant 255 : i32
    %388 = tpu.dynamic_rotate %356 by %c255_i32_117 dim 1 : vector<8x256xf32>, i32 -> vector<8x256xf32>
    %389 = vector.extract_strided_slice %2 {offsets = [5, 0], sizes = [1, 256], strides = [1, 1]} : vector<9x256xf32> to vector<1x256xf32>
    %390 = vector.broadcast %389 : vector<1x256xf32> to vector<8x256xf32>
    %391 = arith.mulf %388, %390 : vector<8x256xf32>
    %392 = vector.extract_strided_slice %357 {offsets = [0, 40], sizes = [8, 8], strides = [1, 1]} : vector<8x72xf32> to vector<8x8xf32>
    %cst_118 = arith.constant dense<0.000000e+00> : vector<8x256xf32>
    %393 = tpu.matmul %392, %391, %cst_118 {dimension_numbers = #tpu.dot_dimension_numbers<[1], [0], [0], [1], [0, 0, 1, 1], [], []>} : vector<8x8xf32>, vector<8x256xf32>, vector<8x256xf32> -> vector<8x256xf32>
    %394 = arith.addf %387, %393 : vector<8x256xf32>
    %c241_i32_119 = arith.constant 241 : i32
    %395 = tpu.dynamic_rotate %356 by %c241_i32_119 dim 1 : vector<8x256xf32>, i32 -> vector<8x256xf32>
    %396 = vector.extract_strided_slice %2 {offsets = [6, 0], sizes = [1, 256], strides = [1, 1]} : vector<9x256xf32> to vector<1x256xf32>
    %397 = vector.broadcast %396 : vector<1x256xf32> to vector<8x256xf32>
    %398 = arith.mulf %395, %397 : vector<8x256xf32>
    %399 = vector.extract_strided_slice %357 {offsets = [0, 48], sizes = [8, 8], strides = [1, 1]} : vector<8x72xf32> to vector<8x8xf32>
    %cst_120 = arith.constant dense<0.000000e+00> : vector<8x256xf32>
    %400 = tpu.matmul %399, %398, %cst_120 {dimension_numbers = #tpu.dot_dimension_numbers<[1], [0], [0], [1], [0, 0, 1, 1], [], []>} : vector<8x8xf32>, vector<8x256xf32>, vector<8x256xf32> -> vector<8x256xf32>
    %401 = arith.addf %394, %400 : vector<8x256xf32>
    %c240_i32_121 = arith.constant 240 : i32
    %402 = tpu.dynamic_rotate %356 by %c240_i32_121 dim 1 : vector<8x256xf32>, i32 -> vector<8x256xf32>
    %403 = vector.extract_strided_slice %2 {offsets = [7, 0], sizes = [1, 256], strides = [1, 1]} : vector<9x256xf32> to vector<1x256xf32>
    %404 = vector.broadcast %403 : vector<1x256xf32> to vector<8x256xf32>
    %405 = arith.mulf %402, %404 : vector<8x256xf32>
    %406 = vector.extract_strided_slice %357 {offsets = [0, 56], sizes = [8, 8], strides = [1, 1]} : vector<8x72xf32> to vector<8x8xf32>
    %cst_122 = arith.constant dense<0.000000e+00> : vector<8x256xf32>
    %407 = tpu.matmul %406, %405, %cst_122 {dimension_numbers = #tpu.dot_dimension_numbers<[1], [0], [0], [1], [0, 0, 1, 1], [], []>} : vector<8x8xf32>, vector<8x256xf32>, vector<8x256xf32> -> vector<8x256xf32>
    %408 = arith.addf %401, %407 : vector<8x256xf32>
    %c239_i32_123 = arith.constant 239 : i32
    %409 = tpu.dynamic_rotate %356 by %c239_i32_123 dim 1 : vector<8x256xf32>, i32 -> vector<8x256xf32>
    %410 = vector.extract_strided_slice %2 {offsets = [8, 0], sizes = [1, 256], strides = [1, 1]} : vector<9x256xf32> to vector<1x256xf32>
    %411 = vector.broadcast %410 : vector<1x256xf32> to vector<8x256xf32>
    %412 = arith.mulf %409, %411 : vector<8x256xf32>
    %413 = vector.extract_strided_slice %357 {offsets = [0, 64], sizes = [8, 8], strides = [1, 1]} : vector<8x72xf32> to vector<8x8xf32>
    %cst_124 = arith.constant dense<0.000000e+00> : vector<8x256xf32>
    %414 = tpu.matmul %413, %412, %cst_124 {dimension_numbers = #tpu.dot_dimension_numbers<[1], [0], [0], [1], [0, 0, 1, 1], [], []>} : vector<8x8xf32>, vector<8x256xf32>, vector<8x256xf32> -> vector<8x256xf32>
    %415 = arith.addf %408, %414 : vector<8x256xf32>
    %c0_125 = arith.constant 0 : index
    %c0_126 = arith.constant 0 : index
    %416 = vector.load %arg17[%c0_125, %c0_126] : memref<8x2xf32, #tpu.memory_space<vmem>>, vector<8x2xf32>
    %417 = vector.extract_strided_slice %416 {offsets = [0, 0], sizes = [8, 1], strides = [1, 1]} : vector<8x2xf32> to vector<8x1xf32>
    %418 = vector.extract_strided_slice %416 {offsets = [0, 1], sizes = [8, 1], strides = [1, 1]} : vector<8x2xf32> to vector<8x1xf32>
    %cst_127 = arith.constant dense<0.000000e+00> : vector<8xf32>
    %419 = vector.multi_reduction <add>, %415, %cst_127 [1] : vector<8x256xf32> to vector<8xf32>
    %420 = vector.shape_cast %419 : vector<8xf32> to vector<8x1xf32>
    %cst_128 = arith.constant 2.560000e+02 : f32
    %421 = vector.broadcast %cst_128 : f32 to vector<8x1xf32>
    %422 = arith.divf %420, %421 : vector<8x1xf32>
    %423 = arith.mulf %415, %415 : vector<8x256xf32>
    %cst_129 = arith.constant dense<0.000000e+00> : vector<8xf32>
    %424 = vector.multi_reduction <add>, %423, %cst_129 [1] : vector<8x256xf32> to vector<8xf32>
    %425 = vector.shape_cast %424 : vector<8xf32> to vector<8x1xf32>
    %cst_130 = arith.constant 2.560000e+02 : f32
    %426 = vector.broadcast %cst_130 : f32 to vector<8x1xf32>
    %427 = arith.divf %425, %426 : vector<8x1xf32>
    %428 = arith.mulf %422, %422 : vector<8x1xf32>
    %429 = arith.subf %427, %428 : vector<8x1xf32>
    %cst_131 = arith.constant 0.000000e+00 : f32
    %430 = vector.broadcast %cst_131 : f32 to vector<8x1xf32>
    %431 = arith.maximumf %429, %430 : vector<8x1xf32>
    %432 = vector.broadcast %422 : vector<8x1xf32> to vector<8x256xf32>
    %433 = arith.subf %415, %432 : vector<8x256xf32>
    %cst_132 = arith.constant 9.99999974E-6 : f32
    %434 = vector.broadcast %cst_132 : f32 to vector<8x1xf32>
    %435 = arith.addf %431, %434 : vector<8x1xf32>
    %436 = math.rsqrt %435 : vector<8x1xf32>
    %437 = vector.broadcast %436 : vector<8x1xf32> to vector<8x256xf32>
    %438 = arith.mulf %433, %437 : vector<8x256xf32>
    %439 = vector.broadcast %417 : vector<8x1xf32> to vector<8x256xf32>
    %440 = arith.mulf %438, %439 : vector<8x256xf32>
    %441 = vector.broadcast %418 : vector<8x1xf32> to vector<8x256xf32>
    %442 = arith.addf %440, %441 : vector<8x256xf32>
    %cst_133 = arith.constant 0.000000e+00 : f32
    %443 = vector.broadcast %cst_133 : f32 to vector<8x256xf32>
    %444 = arith.cmpf oge, %442, %443 : vector<8x256xf32>
    %445 = vector.broadcast %293 : f32 to vector<8x256xf32>
    %446 = arith.mulf %445, %442 : vector<8x256xf32>
    %447 = arith.select %444, %442, %446 : vector<8x256xi1>, vector<8x256xf32>
    %c0_134 = arith.constant 0 : index
    %c0_135 = arith.constant 0 : index
    %c0_136 = arith.constant 0 : index
    %448 = vector.load %arg20[%c0_134, %c0_135, %c0_136] : memref<1x8x256xf32, #tpu.memory_space<vmem>>, vector<1x8x256xf32>
    %449 = vector.shape_cast %448 : vector<1x8x256xf32> to vector<8x256xf32>
    %450 = vector.shape_cast %447 : vector<8x256xf32> to vector<1x8x256xf32>
    tpu.vector_store %arg20[%c0_134, %c0_135, %c0_136], %450 {strides = array<i32>} : memref<1x8x256xf32, #tpu.memory_space<vmem>>, vector<1x8x256xf32>,
    return
  }
  func.func @transform_0(%arg0: i32) -> (i32, i32, i32) {
    %c0_i32 = arith.constant 0 : i32
    %c0_i32_0 = arith.constant 0 : i32
    %c0_i32_1 = arith.constant 0 : i32
    return %arg0, %c0_i32, %c0_i32_0 : i32, i32, i32
  }
  func.func @transform_1(%arg0: i32) -> (i32, i32) {
    %c0_i32 = arith.constant 0 : i32
    %c0_i32_0 = arith.constant 0 : i32
    %c0_i32_1 = arith.constant 0 : i32
    return %c0_i32, %c0_i32_0 : i32, i32
  }
  func.func @transform_2(%arg0: i32) -> i32 {
    %c0_i32 = arith.constant 0 : i32
    %c0_i32_0 = arith.constant 0 : i32
    return %c0_i32 : i32
  }
  func.func @transform_3(%arg0: i32) -> (i32, i32) {
    %c0_i32 = arith.constant 0 : i32
    %c0_i32_0 = arith.constant 0 : i32
    %c0_i32_1 = arith.constant 0 : i32
    return %c0_i32, %c0_i32_0 : i32, i32
  }
  func.func @transform_4(%arg0: i32) -> (i32, i32) {
    %c0_i32 = arith.constant 0 : i32
    %c0_i32_0 = arith.constant 0 : i32
    %c0_i32_1 = arith.constant 0 : i32
    return %c0_i32, %c0_i32_0 : i32, i32
  }
  func.func @transform_5(%arg0: i32) -> (i32, i32) {
    %c0_i32 = arith.constant 0 : i32
    %c0_i32_0 = arith.constant 0 : i32
    %c0_i32_1 = arith.constant 0 : i32
    return %c0_i32, %c0_i32_0 : i32, i32
  }
  func.func @transform_6(%arg0: i32) -> (i32, i32) {
    %c0_i32 = arith.constant 0 : i32
    %c0_i32_0 = arith.constant 0 : i32
    %c0_i32_1 = arith.constant 0 : i32
    return %c0_i32, %c0_i32_0 : i32, i32
  }
  func.func @transform_7(%arg0: i32) -> (i32, i32) {
    %c0_i32 = arith.constant 0 : i32
    %c0_i32_0 = arith.constant 0 : i32
    %c0_i32_1 = arith.constant 0 : i32
    return %c0_i32, %c0_i32_0 : i32, i32
  }
  func.func @transform_8(%arg0: i32) -> (i32, i32) {
    %c0_i32 = arith.constant 0 : i32
    %c0_i32_0 = arith.constant 0 : i32
    %c0_i32_1 = arith.constant 0 : i32
    return %c0_i32, %c0_i32_0 : i32, i32
  }
  func.func @transform_9(%arg0: i32) -> (i32, i32) {
    %c0_i32 = arith.constant 0 : i32
    %c0_i32_0 = arith.constant 0 : i32
    %c0_i32_1 = arith.constant 0 : i32
    return %c0_i32, %c0_i32_0 : i32, i32
  }
  func.func @transform_10(%arg0: i32) -> (i32, i32) {
    %c0_i32 = arith.constant 0 : i32
    %c0_i32_0 = arith.constant 0 : i32
    %c0_i32_1 = arith.constant 0 : i32
    return %c0_i32, %c0_i32_0 : i32, i32
  }
  func.func @transform_11(%arg0: i32) -> (i32, i32) {
    %c0_i32 = arith.constant 0 : i32
    %c0_i32_0 = arith.constant 0 : i32
    %c0_i32_1 = arith.constant 0 : i32
    return %c0_i32, %c0_i32_0 : i32, i32
  }
  func.func @transform_12(%arg0: i32) -> (i32, i32) {
    %c0_i32 = arith.constant 0 : i32
    %c0_i32_0 = arith.constant 0 : i32
    %c0_i32_1 = arith.constant 0 : i32
    return %c0_i32, %c0_i32_0 : i32, i32
  }
  func.func @transform_13(%arg0: i32) -> (i32, i32) {
    %c0_i32 = arith.constant 0 : i32
    %c0_i32_0 = arith.constant 0 : i32
    %c0_i32_1 = arith.constant 0 : i32
    return %c0_i32, %c0_i32_0 : i32, i32
  }
  func.func @transform_14(%arg0: i32) -> (i32, i32) {
    %c0_i32 = arith.constant 0 : i32
    %c0_i32_0 = arith.constant 0 : i32
    %c0_i32_1 = arith.constant 0 : i32
    return %c0_i32, %c0_i32_0 : i32, i32
  }
  func.func @transform_15(%arg0: i32) -> (i32, i32) {
    %c0_i32 = arith.constant 0 : i32
    %c0_i32_0 = arith.constant 0 : i32
    %c0_i32_1 = arith.constant 0 : i32
    return %c0_i32, %c0_i32_0 : i32, i32
  }
  func.func @transform_16(%arg0: i32) -> (i32, i32) {
    %c0_i32 = arith.constant 0 : i32
    %c0_i32_0 = arith.constant 0 : i32
    %c0_i32_1 = arith.constant 0 : i32
    return %c0_i32, %c0_i32_0 : i32, i32
  }
  func.func @transform_17(%arg0: i32) -> (i32, i32, i32) {
    %c0_i32 = arith.constant 0 : i32
    %c0_i32_0 = arith.constant 0 : i32
    %c0_i32_1 = arith.constant 0 : i32
    return %arg0, %c0_i32, %c0_i32_0 : i32, i32, i32
  }
  func.func @transform_18(%arg0: i32) -> (i32, i32, i32) {
    %c0_i32 = arith.constant 0 : i32
    %c0_i32_0 = arith.constant 0 : i32
    %c0_i32_1 = arith.constant 0 : i32
    return %arg0, %c0_i32, %c0_i32_0 : i32, i32, i32
  }
  func.func @transform_19(%arg0: i32) -> (i32, i32, i32) {
    %c0_i32 = arith.constant 0 : i32
    %c0_i32_0 = arith.constant 0 : i32
    %c0_i32_1 = arith.constant 0 : i32
    return %arg0, %c0_i32, %c0_i32_0 : i32, i32, i32
  }
}

</mosaic_0001>

<bundles_post_ra>
// kernel: tpu_custom_call.1
= control target key start
LH: loop header
LB: loop body
LE: loop exit
PB: predicated region body
PF: predicated region fallthrough
CT: control target
= control target key end

     0   :  { %s5702_s0 = inlined_call_operand.vmem [shape: f32[2,4,256], index: 0, kind: input, shape index: {}]   ;;  %s5703_s1 = inlined_call_operand.vmem [shape: f32[9,256], index: 1, kind: input, shape index: {}]   ;;  %s5704_s2 = inlined_call_operand.vmem [shape: f32[12], index: 2, kind: input, shape index: {}]   ;;  %s5705_s3 = inlined_call_operand.vmem [shape: f32[8,4], index: 3, kind: input, shape index: {}]   ;;  %s5706_s4 = inlined_call_operand.vmem [shape: f32[8,2], index: 4, kind: input, shape index: {}]   ;;  %s5707_s5 = inlined_call_operand.vmem [shape: f32[8,72], index: 5, kind: input, shape index: {}]   ;;  %s5708_s6 = inlined_call_operand.vmem [shape: f32[8,2], index: 6, kind: input, shape index: {}]   ;;  %s5709_s7 = inlined_call_operand.vmem [shape: f32[8,4], index: 7, kind: input, shape index: {}]   ;;  %s5710_s8 = inlined_call_operand.vmem [shape: f32[8,2], index: 8, kind: input, shape index: {}]   ;;  %s5711_s9 = inlined_call_operand.vmem [shape: f32[2,16], index: 9, kind: input, shape index: {}]   ;;  %s5712_s10 = inlined_call_operand.vmem [shape: f32[16,72], index: 10, kind: input, shape index: {}]   ;;  %s5713_s11 = inlined_call_operand.vmem [shape: f32[16,2], index: 11, kind: input, shape index: {}]   ;;  %s5714_s12 = inlined_call_operand.vmem [shape: f32[8,4], index: 12, kind: input, shape index: {}]   ;;  %s5715_s13 = inlined_call_operand.vmem [shape: f32[8,2], index: 13, kind: input, shape index: {}]   ;;  %s5716_s14 = inlined_call_operand.vmem [shape: f32[2,16], index: 14, kind: input, shape index: {}]   ;;  %s5717_s15 = inlined_call_operand.vmem [shape: f32[8,72], index: 15, kind: input, shape index: {}]   ;;  %s5718_s16 = inlined_call_operand.vmem [shape: f32[8,2], index: 16, kind: input, shape index: {}]   ;;  %s5719_s17 = inlined_call_operand.hbm [shape: f32[2,8,256], index: 17, kind: output, shape index: {0}]   ;;  %s5720_s18 = inlined_call_operand.hbm [shape: f32[2,16,256], index: 18, kind: output, shape index: {1}]   ;;  %s5721_s19 = inlined_call_operand.hbm [shape: f32[2,8,256], index: 19, kind: output, shape index: {2}]  }
   0x1   :  { %5758 = sst [smem:[#allocation15_spill]] %s5702_s0 }
   0x2   :  { %5759 = sst [smem:[#allocation16_spill]] %s5703_s1 }
   0x3   :  { %5760 = sst [smem:[#allocation17_spill]] %s5704_s2 }
   0x4   :  { %5761 = sst [smem:[#allocation18_spill]] %s5705_s3 }
   0x5   :  { %5762 = sst [smem:[#allocation19_spill]] %s5706_s4 }
   0x6   :  { %5763 = sst [smem:[#allocation20_spill]] %s5707_s5 }
   0x7   :  { %5764 = sst [smem:[#allocation21_spill]] %s5708_s6 }
   0x8   :  { %5765 = sst [smem:[#allocation22_spill]] %s5709_s7 }
   0x9   :  { %5766 = sst [smem:[#allocation23_spill]] %s5710_s8 }
   0xa   :  { %25 = vsyncpa [#allocation4], 0 }
   0xb   :  { %26 = vsyncpa [#allocation3], 0 }
   0xc   :  { %28 = vsyncpa [#allocation3 + $0x1], 0 }
   0xd   :  { %29 = vsyncpa [#allocation7], 0 }
   0xe   :  { %31 = vsyncpa [#allocation7 + $0x1], 0  ;;  %s4762_s0 = smov 0   ;;  %s4764_s30 = smov 0  }
   0xf   :  { %s4766_s20 = smov 0   ;;  %s4768_s21 = smov 0  }
  0x10 LB: > { %5767 = sst [smem:[#allocation12_spill]] %s4633_s20  ;;  %s4783_s1 = sadd.s32 4294967295, %s4637_s21   ;;  %s4637_s21 = sphi %s4768_s21, %s5799_s21   ;;  %s4633_s20 = sphi %s4766_s20, %s5801_s20   ;;  %s4629_s30 = sphi %s4764_s30, %s5803_s30   ;;  %s4625_s0 = sphi %s4762_s0, %s5802_s0  }
  0x11   : > { %s5723_s22 = sadd.s32 4294967294, %s4637_s21   ;;  %s4787_s2 = sadd.s32 1, %s4637_s21  }
  0x12   : > { %5768 = sst [smem:[#allocation13_spill]] %s4787_s2  ;;  %s406_s23 = sadd.s32 1, %s4633_s20 }
  0x13   : > { %s403_s24 = ssub.s32 %s4637_s21, %s4787_s2  ;;  %p416_p0 = scmp.ne.s32.totalorder %s4633_s20, %s4629_s30 }
  0x14   : > { %p404_p1 = scmp.eq.s32.totalorder %s403_s24, 0  ;;  %p417_p2 = scmp.eq.s32.totalorder %s4783_s1, 1 }
  0x15   : > { %p422_p3 = scmp.ne.s32.totalorder %s4629_s30, %s4625_s0  ;;  %p423_p4 = scmp.eq.s32.totalorder %s5723_s22, 1 }
  0x16   : > { %s4800_s25 = scalar_select %p404_p1, %s4633_s20, %s406_s23  }
  0x17   : > { %p4802_p5 = por %p417_p2, %p416_p0  ;;  %p4806_p6 = por %p423_p4, %p422_p3 }
  0x18   : > { %5769 = sst [smem:[#allocation14_spill]] %s4800_s25  ;;  %p4199_p7 = scmp.ge.s32.totalorder %s4637_s21, 1 }
  0x19   : > { %p482_p8 = scmp.lt.s32.totalorder %s4637_s21, 3  ;;  %p4384_p9 = scmp.eq.s32.totalorder %s4783_s1, 0 }
  0x1a   : > { %s5773_s24 = sld [smem:[#allocation17_spill]] }
  0x1b   : > { %p4813_p10 = pnand %p4199_p7, %p482_p8 }
  0x1d   : > { %p4370_p11 = pneg %p4813_p10 }
  0x1f   : > { %p4371_p12 = pnand %p4384_p9, %p4370_p11 }
  0x20   : > { %s498_s23 = sshll.u32 %s5773_s24, 4  ;;  %s499_s23 = int_to_ptr.vmem [resolvable:$true] %s498_s23 }
  0x21   : > { %s4496_s22 = scalar_lea.vmem %s499_s23, 16  ;;  %p4498_p0 = pneg %p4371_p12 }
  0x22   : > { %p4497_p13 = scmp.ne.s32.totalorder %s499_s23, %s4496_s22  ;;  %p4504_p3 = scmp.lt.s32.totalorder %s499_s23, %s499_s23 }
  0x23   : > { %p4505_p4 = scmp.lt.s32.totalorder %s4496_s22, %s4496_s22 }
  0x24   : > { %p4499_p1 = pnand %p4498_p0, %p4497_p13 }
  0x25   : > { %p4506_p7 = por %p4505_p4, %p4504_p3 }
  0x26   : > { %p4500_p2 = pneg %p4499_p1 }
  0x28   : > { %p4507_p8 = pnand %p4506_p7, %p4500_p2 }
  0x2a   : > { %4510 = shalt.err (!%p4507_p8)
}
  0x2b   : > { %s4639_s25 = smov [#allocation2]   ;;  %561 = sbr.rel (%p4813_p10) target bundleno = 1944 (0x798), region = 88 }
  0x2c   : > { %4373 = dma.vmem_to_smem (!%p4371_p12), %s499_s23, 16, %s4639_s25, [#allocation4]  }
  0x32   : > { %4612 = dma.done.wait (%p4384_p9), [#allocation4], 16  }
  0x33   : > { %4614 = vsyncadd (%p4384_p9), [#allocation4], 4294967280 }
  0x34   : > { %567 = sfence }
  0x35   : > { %p628_p11 = scmp.lt.s32.totalorder %s4783_s1, 1  ;;  %v4640_v0 = vmov 0.0   ;;  %s5774_s29 = sld [smem:[#allocation15_spill]]  ;;  %vm647_vm0 = vcmask 1043456   ;;  %vm643_vm1 = vcmask 31744   ;;  %v4641_v6 = vmov 0  }
  0x36   : > { %716 = vmatprep.mubr.f32.mxu0 %v4640_v0  ;;  %871 = vmatprep.mubr.f32.mxu1 %v4640_v0  ;;  %s5775_s2 = sld [smem:[#allocation18_spill]]  ;;  %s5776_s4 = sld [smem:[#allocation19_spill]]  ;;  %v4642_v7 = vmov 1   ;;  %v769_v46 = vlaneseq  ;;  %v4949_v47 = vld [vmem:[%s5711_s9] sm:$0x3]  ;;  %vm804_vm5 = vcmask 64512  }
  0x37   : > { %s629_s22 = scalar_select %p628_p11, %s4783_s1, 1  ;;  %4439 = vset.pattern.permute.xlu1 %v4641_v6  ;;  %4441 = vset.pattern.permute.xlu0 %v4641_v6 }
  0x38   : > { %s5777_s7 = sld [smem:[#allocation22_spill]]  ;;  %s5778_s5 = sld [smem:[#allocation20_spill]]  ;;  %v4951_v48 = vshrl.u32 %v769_v46, 7  ;;  %v4956_v50 = vand.u32 127, %v769_v46 }
  0x39   : > { %s4288_s25 = sshll.u32 %s629_s22, 3  ;;  %s5729_s23 = smov 16  }
  0x3a   : > { %s5727_s22 = smov 17   ;;  %s5751_s20 = smov 112   ;;  %v4959_v51 = vsub.s32 1, %v4951_v48  ;;  %vm788_vm4 = vcmp.lt.s32.totalorder %v4956_v50, 16  ;;  %v4985_v60 = vsub.s32 0, %v4951_v48  ;;  %vm771_vm6 = vcmp.lt.s32.totalorder %v4956_v50, 17 }
  0x3b   : > { %s632_s24 = scalar_lea.vmem %s5774_s29, %s4288_s25  ;;  %s4643_s29 = smov 120   ;;  %vm955_vm7 = vcmp.lt.s32.totalorder %v4956_v50, 15  ;;  %vm1049_vm8 = vcmp.lt.s32.totalorder %v4956_v50, 1  ;;  %vm1220_vm9 = vcmp.lt.s32.totalorder %v4956_v50, 127  ;;  %vm1314_vm10 = vcmp.lt.s32.totalorder %v4956_v50, 113 }
  0x3c   : > { %v4837_v1 = vld [vmem:[%s632_s24] sm:$0xff]  ;;  %s638_s24 = sld [smem:[#allocation2]]  ;;  %s5753_s25 = smov 15   ;;  %vm1408_vm11 = vcmp.lt.s32.totalorder %v4956_v50, 112  ;;  %vm1502_vm12 = vcmp.lt.s32.totalorder %v4956_v50, 111  ;;  %v2813_v50 = vld [vmem:[%s5713_s11 + $0x8] sm:$0xff] }
  0x3d   : > { %v4841_v2 = vcombine.high %v4837_v1, %v4837_v1  ;;  %v640_v3 = vld [vmem:[%s5775_s2] sm:$0xff]  ;;  %s5733_s2 = smov 1   ;;  %s5731_s28 = smov 96  }
  0x3e   : > { %v723_v4 = vld [vmem:[%s5776_s4] sm:$0xff]  ;;  %s5745_s27 = smov 127   ;;  %s5779_s8 = sld [smem:[#allocation23_spill]] }
  0x3f   : > { %4210 = vmatprep.subr.msk.mxu0 %vm647_vm0, %v4841_v2  ;;  %v1636_v5 = vld [vmem:[%s5777_s7] sm:$0xff]  ;;  %746 = vperm.xlu1 %4439, %v723_v4   ;;  %s4255_s4 = sld [smem:[#allocation2 + $0x8]]  ;;  %s5795_s6 = sld [smem:[#allocation21_spill]] }
  0x40   : > { %4211 = vmatpush1.msk.msra.mxu0 %vm647_vm0, %v4837_v1  ;;  %v4870_v14 = vld [vmem:[%s5778_s5] sm:$0xff] }
  0x41   : > { %4212 = vmatmul.mubr.msk.f32.vlgmr.msra.gmra.mrb[0].mxu0 %vm643_vm1, %v640_v3  ;;  %4226 = vmatprep.subr.msk.mxu0 %vm647_vm0, %v4841_v2 }
  0x42   : > { %4227 = vmatpush1.msk.msra.mxu0 %vm647_vm0, %v4837_v1  ;;  %1704 = vmatprep.mubr.f32.mxu0 %v4640_v0  ;;  %v759_v38 = vstv %s638_s24  ;;  %s5741_s24 = smov 113  }
  0x43   : > { %4440 = vset.pattern.permute.xlu1 %v4642_v7 }
  0x44   : > { %752 = vperm.xlu1 %4440, %v723_v4   ;;  %v1711_v45 = vld [vmem:[%s5779_s8] sm:$0xff] }
  0x45   : > { %4228 = vmatmul.mubr.msk.f32.vlgmr.msra.gmra.mrb[2].mxu0 %vm643_vm1, %v1636_v5 }
  0x46   : > { %1821 = vmatprep.mubr.f32.mxu0 %v4640_v0 }
  0x48   : > { %802 = vrot.lane.b32.xlu1 %v4870_v14, %s4643_s29 }
  0xbe   : > { %v747_v29 = vpop.permute.xlu1 %746 }
  0xc3   : > { %v753_v35 = vpop.permute.xlu1 %752 }
  0xc7   : > { %v803_v49 = vpop.permute.xlu1 %802 }
 0x114   : > { %v718_v8 = vpop.f32.mrb[0].mxu0 }
 0x115   : > { %v720_v9 = vpop.f32.mrb[1].mxu0  ;;  %v729_v10 = vmul.f32 %v718_v8, %v718_v8 }
 0x116   : > { %v724_v11 = vadd.f32 %v720_v9, %v718_v8  ;;  %v730_v12 = vmul.f32 %v720_v9, %v720_v9 }
 0x118   : > { %725 = vadd.xlane.f32.xlu0 %v724_v11  ;;  %v731_v13 = vadd.f32 %v730_v12, %v729_v10  ;;  %v4874_v15 = vpop.f32.mrb[2].mxu0 }
 0x119   : > { %v4876_v16 = vpop.f32.mrb[3].mxu0  ;;  %v1716_v18 = vmul.f32 %v4874_v15, %v4874_v15 }
 0x11a   : > { %v4880_v17 = vadd.f32 %v4876_v16, %v4874_v15  ;;  %v1717_v19 = vmul.f32 %v4876_v16, %v4876_v16 }
 0x11c   : > { %732 = vadd.xlane.f32.xlu0 %v731_v13  ;;  %v4886_v20 = vadd.f32 %v1717_v19, %v1716_v18  ;;  %v960_v13 = vsub.s32 2, %v4951_v48 }
 0x1a5   : > { %v726_v21 = vpop.xlane.xlu0 %725 }
 0x1a6   : > { %v728_v22 = vmul.f32 0.00390625, %v726_v21 }
 0x1a8   : > { %v735_v24 = vmul.f32 %v728_v22, %v728_v22  ;;  %v738_v30 = vsub.f32 %v718_v8, %v728_v22  ;;  %v739_v31 = vsub.f32 %v720_v9, %v728_v22 }
 0x1a9   : > { %v733_v23 = vpop.xlane.xlu0 %732 }
 0x1aa   : > { %v734_v25 = vmul.f32 0.00390625, %v733_v23 }
 0x1ac   : > { %v736_v26 = vsub.f32 %v734_v25, %v735_v24 }
 0x1ae   : > { %v737_v27 = vmax.f32 %v736_v26, 0.0 }
 0x1b0   : > { %v740_v28 = vadd.f32 1e-05, %v737_v27 }
 0x1b2   : > { %4450 = vrsqrt.f32 %v740_v28 }
 0x1bc   : > { %v4451_v32 = vpop.eup %4450 }
 0x1bd   : > { %v742_v33 = vmul.f32 %v4451_v32, %v738_v30  ;;  %v743_v34 = vmul.f32 %v4451_v32, %v739_v31 }
 0x1bf   : > { %v749_v36 = vmul.f32 %v747_v29, %v742_v33  ;;  %v750_v37 = vmul.f32 %v747_v29, %v743_v34  ;;  %v1225_v34 = vsub.s32 5, %v4951_v48 }
 0x1c1   : > { %v755_v39 = vadd.f32 %v753_v35, %v749_v36  ;;  %v756_v40 = vadd.f32 %v753_v35, %v750_v37 }
 0x1c3   : > { %vm757_vm2 = vcmp.ge.f32.partialorder %v755_v39, 0.0  ;;  %vm758_vm3 = vcmp.ge.f32.partialorder %v756_v40, 0.0  ;;  %v760_v41 = vmul.f32 %v759_v38, %v755_v39  ;;  %v761_v42 = vmul.f32 %v759_v38, %v756_v40 }
 0x1c5   : > { %v4888_v43 = vsel %vm757_vm2, %v755_v39, %v760_v41  ;;  %v4890_v44 = vsel %vm758_vm3, %v756_v40, %v761_v42  ;;  %v1319_v41 = vsub.s32 6, %v4951_v48 }
 0x1c6   : > { %786 = vrot.lane.b32.xlu1 %v4890_v44, %s5729_s23  ;;  %1757 = vmatprep.subr.mxu0 %v4890_v44 }
 0x1c7   : > { %784 = vrot.lane.b32.xlu0 %v4888_v43, %s5729_s23  ;;  %1758 = vmatpush1.msra.mxu0 %v4888_v43  ;;  %s5737_s23 = smov 80  }
 0x1ca   : > { %765 = vrot.lane.b32.xlu1 %v4888_v43, %s5727_s22 }
 0x1cb   : > { %968 = vrot.lane.b32.xlu0 %v4870_v14, %s5751_s20 }
 0x1ce   : > { %767 = vrot.lane.b32.xlu1 %v4890_v44, %s5727_s22  ;;  %s5735_s22 = smov 104  }
 0x1cf   : > { %1047 = vrot.lane.b32.xlu0 %v4890_v44, %s5733_s2 }
 0x1d2   : > { %951 = vrot.lane.b32.xlu1 %v4888_v43, %s5753_s25 }
 0x1d3   : > { %1139 = vrot.lane.b32.xlu0 %v4870_v14, %s5731_s28  ;;  %s5739_s28 = smov 88  }
 0x1d6   : > { %953 = vrot.lane.b32.xlu1 %v4890_v44, %s5753_s25 }
 0x1d7   : > { %1218 = vrot.lane.b32.xlu0 %v4890_v44, %s5745_s27 }
 0x1da   : > { %1045 = vrot.lane.b32.xlu1 %v4888_v43, %s5733_s2  ;;  %s5747_s2 = smov 111  }
 0x1db   : > { %1310 = vrot.lane.b32.xlu0 %v4888_v43, %s5741_s24 }
 0x1de   : > { %1062 = vrot.lane.b32.xlu1 %v4870_v14, %s5735_s22  ;;  %s5743_s22 = smov 64  }
 0x1df   : > { %1327 = vrot.lane.b32.xlu0 %v4870_v14, %s5737_s23  ;;  %s5749_s23 = smov 72  }
 0x1e2   : > { %1216 = vrot.lane.b32.xlu1 %v4888_v43, %s5745_s27  ;;  %s5788_s27 = smov 96  }
 0x1e3   : > { %1406 = vrot.lane.b32.xlu0 %v4890_v44, %s5751_s20 }
 0x1e6   : > { %1233 = vrot.lane.b32.xlu1 %v4870_v14, %s5739_s28  ;;  %s5782_s28 = smov 1  }
 0x1e7   : > { %1498 = vrot.lane.b32.xlu0 %v4888_v43, %s5747_s2 }
 0x1ea   : > { %1312 = vrot.lane.b32.xlu1 %v4890_v44, %s5741_s24  ;;  %s5786_s24 = smov 15  }
 0x1eb   : > { %1515 = vrot.lane.b32.xlu0 %v4870_v14, %s5743_s22  ;;  %s4224_s22 = sld [smem:[#allocation2 + $0x4]] }
 0x1ee   : > { %1404 = vrot.lane.b32.xlu1 %v4888_v43, %s5751_s20  ;;  %s4234_s20 = sld [smem:[#allocation2 + $0x7]] }
 0x1f2   : > { %1421 = vrot.lane.b32.xlu1 %v4870_v14, %s5749_s23  ;;  %s4231_s23 = sld [smem:[#allocation2 + $0x6]] }
 0x1f6   : > { %1500 = vrot.lane.b32.xlu1 %v4890_v44, %s5747_s2  ;;  %s5780_s2 = sld [smem:[#allocation16_spill]] }
 0x1fc   : > { %v4964_v52 = vld [vmem:[%s5780_s2 + $0x8] sm:$0xff]  ;;  %v4969_v53 = vld [vmem:[%s5780_s2] sm:$0xff] }
 0x1fd   : > { %v4974_v54 = vrot.slane %v4964_v52, %v4959_v51  ;;  %v4978_v55 = vrot.slane %v4969_v53, %v4959_v51  ;;  %v4992_v3 = vrot.slane %v4969_v53, %v4985_v60  ;;  %v4996_v4 = vrot.slane %v4964_v52, %v4985_v60 }
 0x1fe   : > { %v5009_v19 = vrot.slane %v4969_v53, %v960_v13  ;;  %v5013_v21 = vrot.slane %v4964_v52, %v960_v13  ;;  %v5043_v37 = vrot.slane %v4964_v52, %v1225_v34  ;;  %v5053_v46 = vrot.slane %v4969_v53, %v1225_v34 }
 0x20a   : > { %1719 = vadd.xlane.f32.xlu0 %v4886_v20  ;;  %v1054_v20 = vsub.s32 3, %v4951_v48 }
 0x20c   : > { %v5025_v26 = vrot.slane %v4969_v53, %v1054_v20 }
 0x21a   : > { %1713 = vadd.xlane.f32.xlu1 %v4880_v17 }
 0x220   : > { %1733 = vperm.xlu0 %4441, %v1711_v45  }
 0x224   : > { %4443 = vset.pattern.permute.xlu0 %v4642_v7 }
 0x22b   : > { %1739 = vperm.xlu1 %4440, %v1711_v45  }
 0x22f   : > { %1753 = vrot.lane.b32.xlu1 %v4949_v47, %s4643_s29 }
 0x230   : > { %4442 = vset.pattern.permute.xlu1 %v4641_v6 }
 0x238   : > { %v787_v56 = vpop.permute.xlu1 %786 }
 0x239   : > { %v785_v57 = vpop.permute.xlu0 %784 }
 0x23a   : > { %v790_v58 = vsel %vm788_vm4, %v787_v56, %v785_v57  ;;  %v789_v59 = vsel %vm788_vm4, %v785_v57, %v787_v56 }
 0x23b   : > { %v800_v61 = vmul.f32 %v4974_v54, %v789_v59  ;;  %v799_v62 = vmul.f32 %v4978_v55, %v790_v58 }
 0x23c   : > { %v766_v63 = vpop.permute.xlu1 %765 }
 0x23d   : > { %807 = vmatprep.subr.mxu1 %v800_v61  ;;  %v969_v5 = vpop.permute.xlu0 %968 }
 0x23e   : > { %808 = vmatpush1.msra.mxu1 %v799_v62 }
 0x23f   : > { %4213 = vmatmul.mubr.msk.f32.vlgmr.msra.gmra.mrb[0].mxu1 %vm804_vm5, %v803_v49  ;;  %v5057_v49 = vrot.slane %v4964_v52, %v1319_v41 }
 0x240   : > { %v768_v8 = vpop.permute.xlu1 %767  ;;  %944 = vmatprep.mubr.f32.mxu1 %v4640_v0 }
 0x241   : > { %v772_v9 = vsel %vm771_vm6, %v766_v63, %v768_v8  ;;  %v773_v10 = vsel %vm771_vm6, %v768_v8, %v766_v63  ;;  %v1048_v18 = vpop.permute.xlu0 %1047  ;;  %v1413_v63 = vsub.s32 7, %v4951_v48  ;;  %v5070_v8 = vrot.slane %v4969_v53, %v1319_v41 }
 0x242   : > { %v782_v11 = vmul.f32 %v4992_v3, %v773_v10  ;;  %v783_v12 = vmul.f32 %v4996_v4, %v772_v9 }
 0x244   : > { %v952_v17 = vpop.permute.xlu1 %951  ;;  %880 = vmatprep.subr.mxu1 %v783_v12 }
 0x245   : > { %881 = vmatpush1.msra.mxu1 %v782_v11  ;;  %v1140_v28 = vpop.permute.xlu0 %1139  ;;  %v5075_v11 = vrot.slane %v4964_v52, %v1413_v63 }
 0x247   : > { %4214 = vmatmul.mubr.msk.f32.vlgmr.msra.gmra.mrb[0].mxu1 %vm804_vm5, %v4870_v14  ;;  %v5029_v14 = vrot.slane %v4964_v52, %v1054_v20  ;;  %v5085_v52 = vrot.slane %v4969_v53, %v1413_v63  ;;  %v5103_v53 = vld [vmem:[%s5780_s2 + $0x10] ss:$0 sm:$0xff] }
 0x248   : > { %v954_v22 = vpop.permute.xlu1 %953  ;;  %1036 = vmatprep.mubr.f32.mxu1 %v4640_v0 }
 0x249   : > { %v956_v23 = vsel %vm955_vm7, %v952_v17, %v954_v22  ;;  %v957_v24 = vsel %vm955_vm7, %v954_v22, %v952_v17  ;;  %v1219_v36 = vpop.permute.xlu0 %1218 }
 0x24a   : > { %v966_v25 = vmul.f32 %v5009_v19, %v957_v24  ;;  %v967_v27 = vmul.f32 %v5013_v21, %v956_v23  ;;  %v5094_v24 = vld [vmem:[%s5780_s2 + $0x18] ss:$0 sm:$0xff]  ;;  %s5784_s2 = smov 17  }
 0x24c   : > { %v1046_v29 = vpop.permute.xlu1 %1045  ;;  %972 = vmatprep.subr.mxu1 %v967_v27 }
 0x24d   : > { %v1050_v30 = vsel %vm1049_vm8, %v1046_v29, %v1048_v18  ;;  %v1051_v31 = vsel %vm1049_vm8, %v1048_v18, %v1046_v29  ;;  %973 = vmatpush1.msra.mxu1 %v966_v25  ;;  %v1311_v42 = vpop.permute.xlu0 %1310 }
 0x24e   : > { %v1060_v32 = vmul.f32 %v5025_v26, %v1051_v31  ;;  %v1061_v33 = vmul.f32 %v5029_v14, %v1050_v30  ;;  %v2897_v31 = vld [vmem:[%s5714_s12] sm:$0xff] }
 0x24f   : > { %4215 = vmatmul.mubr.msk.f32.vlgmr.msra.gmra.mrb[0].mxu1 %vm804_vm5, %v969_v5 }
 0x250   : > { %v1063_v35 = vpop.permute.xlu1 %1062  ;;  %1066 = vmatprep.subr.mxu1 %v1061_v33  ;;  %1130 = vmatprep.mubr.f32.mxu1 %v4640_v0 }
 0x251   : > { %1067 = vmatpush1.msra.mxu1 %v1060_v32  ;;  %v1328_v58 = vpop.permute.xlu0 %1327 }
 0x252   : > { %1143 = vmatprep.subr.mxu1 %v4890_v44 }
 0x254   : > { %v1217_v38 = vpop.permute.xlu1 %1216 }
 0x255   : > { %v1222_v39 = vsel %vm1220_vm9, %v1219_v36, %v1217_v38  ;;  %v1221_v56 = vsel %vm1220_vm9, %v1217_v38, %v1219_v36  ;;  %v1407_v9 = vpop.permute.xlu0 %1406 }
 0x256   : > { %v1232_v40 = vmul.f32 %v5043_v37, %v1222_v39  ;;  %v1231_v61 = vmul.f32 %v5053_v46, %v1221_v56 }
 0x257   : > { %4216 = vmatmul.mubr.msk.f32.vlgmr.msra.gmra.mrb[0].mxu1 %vm804_vm5, %v1063_v35 }
 0x258   : > { %1144 = vmatpush1.msra.mxu1 %v4888_v43  ;;  %v1234_v45 = vpop.permute.xlu1 %1233  ;;  %1207 = vmatprep.mubr.f32.mxu1 %v4640_v0 }
 0x259   : > { %1237 = vmatprep.subr.mxu1 %v1232_v40  ;;  %v1499_v20 = vpop.permute.xlu0 %1498 }
 0x25c   : > { %v1313_v57 = vpop.permute.xlu1 %1312 }
 0x25d   : > { %v1316_v59 = vsel %vm1314_vm10, %v1313_v57, %v1311_v42  ;;  %v1315_v10 = vsel %vm1314_vm10, %v1311_v42, %v1313_v57  ;;  %v1516_v30 = vpop.permute.xlu0 %1515 }
 0x25e   : > { %v1326_v62 = vmul.f32 %v5057_v49, %v1316_v59  ;;  %v1325_v13 = vmul.f32 %v5070_v8, %v1315_v10 }
 0x25f   : > { %4217 = vmatmul.mubr.msk.f32.vlgmr.msra.gmra.mrb[0].mxu1 %vm804_vm5, %v1140_v28 }
 0x260   : > { %1238 = vmatpush1.msra.mxu1 %v1231_v61  ;;  %v1405_v5 = vpop.permute.xlu1 %1404  ;;  %1301 = vmatprep.mubr.f32.mxu1 %v4640_v0 }
 0x261   : > { %1331 = vmatprep.subr.mxu1 %v1326_v62  ;;  %v1410_v48 = vsel %vm1408_vm11, %v1407_v9, %v1405_v5  ;;  %v1409_v22 = vsel %vm1408_vm11, %v1405_v5, %v1407_v9  ;;  %v1746_v62 = vstv %s4224_s22  ;;  %s4265_s22 = sld [smem:[#allocation2 + $0xb]] }
 0x262   : > { %v1420_v17 = vmul.f32 %v5075_v11, %v1410_v48  ;;  %v1419_v25 = vmul.f32 %v5085_v52, %v1409_v22 }
 0x264   : > { %v1422_v12 = vpop.permute.xlu1 %1421 }
 0x267   : > { %4218 = vmatmul.mubr.msk.f32.vlgmr.msra.gmra.mrb[0].mxu1 %vm804_vm5, %v1234_v45 }
 0x268   : > { %1332 = vmatpush1.msra.mxu1 %v1325_v13  ;;  %1395 = vmatprep.mubr.f32.mxu1 %v4640_v0  ;;  %v1501_v18 = vpop.permute.xlu1 %1500 }
 0x269   : > { %1425 = vmatprep.subr.mxu1 %v1420_v17  ;;  %v1504_v23 = vsel %vm1502_vm12, %v1501_v18, %v1499_v20  ;;  %v1503_v28 = vsel %vm1502_vm12, %v1499_v20, %v1501_v18 }
 0x26a   : > { %v1514_v27 = vmul.f32 %v5094_v24, %v1504_v23  ;;  %v1513_v29 = vmul.f32 %v5103_v53, %v1503_v28 }
 0x26f   : > { %4219 = vmatmul.mubr.msk.f32.vlgmr.msra.gmra.mrb[0].mxu1 %vm804_vm5, %v1328_v58 }
 0x270   : > { %1426 = vmatpush1.msra.mxu1 %v1419_v25  ;;  %1489 = vmatprep.mubr.f32.mxu1 %v4640_v0 }
 0x271   : > { %1519 = vmatprep.subr.mxu1 %v1514_v27 }
 0x277   : > { %4220 = vmatmul.mubr.msk.f32.vlgmr.msra.gmra.mrb[0].mxu1 %vm804_vm5, %v1422_v12 }
 0x278   : > { %1520 = vmatpush1.msra.mxu1 %v1513_v29  ;;  %1583 = vmatprep.mubr.f32.mxu1 %v4640_v0  ;;  %v2972_v29 = vld [vmem:[%s5715_s13] sm:$0xff] }
 0x279   : > { %4257 = vmatprep.subr.msk.mxu1 %vm647_vm0, %v4841_v2 }
 0x27f   : > { %4223 = vmatmul.mubr.msk.f32.vlgmr.msra.gmra.mrb[0].mxu1 %vm804_vm5, %v1516_v30  ;;  %v5161_v30 = vld [vmem:[%s5716_s14] sm:$0x3] }
 0x280   : > { %4258 = vmatpush1.msk.msra.mxu1 %vm647_vm0, %v4837_v1  ;;  %2965 = vmatprep.mubr.f32.mxu1 %v4640_v0 }
 0x283   : > { %4259 = vmatmul.mubr.msk.f32.vlgmr.msra.gmra.mrb[2].mxu1 %vm643_vm1, %v2897_v31  ;;  %v1902_v31 = vstv %s4231_s23  ;;  %s5781_s23 = smov 16  }
 0x284   : > { %3082 = vmatprep.mubr.f32.mxu1 %v4640_v0 }
 0x297   : > { %v1720_v32 = vpop.xlane.xlu0 %1719 }
 0x298   : > { %v1721_v2 = vmul.f32 0.00390625, %v1720_v32  ;;  %v1918_v32 = vstv %s4234_s20  ;;  %s5785_s20 = smov 104  }
 0x29f   : > { %v1734_v56 = vpop.permute.xlu0 %1733 }
 0x2a7   : > { %v1714_v33 = vpop.xlane.xlu1 %1713 }
 0x2a8   : > { %v1715_v34 = vmul.f32 0.00390625, %v1714_v33 }
 0x2aa   : > { %v1722_v35 = vmul.f32 %v1715_v34, %v1715_v34  ;;  %v1725_v41 = vsub.f32 %v4874_v15, %v1715_v34  ;;  %v1726_v42 = vsub.f32 %v4876_v16, %v1715_v34 }
 0x2ab   : > { %v1740_v36 = vpop.permute.xlu1 %1739 }
 0x2ac   : > { %v1723_v38 = vsub.f32 %v1721_v2, %v1722_v35 }
 0x2ae   : > { %v1724_v39 = vmax.f32 %v1723_v38, 0.0 }
 0x2af   : > { %v1754_v40 = vpop.permute.xlu1 %1753 }
 0x2b0   : > { %v1727_v1 = vadd.f32 1e-05, %v1724_v39  ;;  %4229 = vmatmul.mubr.msk.f32.vlgmr.msra.gmra.mrb[4].mxu0 %vm804_vm5, %v1754_v40 }
 0x2b1   : > { %1894 = vmatprep.mubr.f32.mxu0 %v4640_v0 }
 0x2b2   : > { %4452 = vrsqrt.f32 %v1727_v1 }
 0x2bc   : > { %v4453_v45 = vpop.eup %4452 }
 0x2bd   : > { %v1729_v57 = vmul.f32 %v4453_v45, %v1725_v41  ;;  %v1730_v58 = vmul.f32 %v4453_v45, %v1726_v42 }
 0x2bf   : > { %v1736_v59 = vmul.f32 %v1734_v56, %v1729_v57  ;;  %v1737_v61 = vmul.f32 %v1734_v56, %v1730_v58 }
 0x2c1   : > { %v1742_v63 = vadd.f32 %v1740_v36, %v1736_v59  ;;  %v1743_v5 = vadd.f32 %v1740_v36, %v1737_v61 }
 0x2c3   : > { %vm1745_vm13 = vcmp.ge.f32.partialorder %v1743_v5, 0.0  ;;  %v1748_v9 = vmul.f32 %v1746_v62, %v1743_v5  ;;  %vm1744_vm14 = vcmp.ge.f32.partialorder %v1742_v63, 0.0  ;;  %v1747_v10 = vmul.f32 %v1746_v62, %v1742_v63 }
 0x2c5   : > { %v5125_v48 = vsel %vm1745_vm13, %v1743_v5, %v1748_v9  ;;  %v1749_v12 = vsel %vm1744_vm14, %v1742_v63, %v1747_v10 }
 0x2c6   : > { %1830 = vmatprep.subr.mxu0 %v5125_v48 }
 0x2c7   : > { %1831 = vmatpush1.msra.mxu0 %v1749_v12 }
 0x2c8   : > { %4230 = vmatmul.mubr.msk.f32.vlgmr.msra.gmra.mrb[4].mxu0 %vm804_vm5, %v4949_v47 }
 0x2c9   : > { %2047 = vmatprep.mubr.f32.mxu0 %v4640_v0 }
 0x352   : > { %v5131_v15 = vpop.f32.mrb[0].mxu1 }
 0x353   : > { %v1597_v16 = vmul.f32 %v5131_v15, %v5131_v15  ;;  %v5135_v13 = vpop.f32.mrb[1].mxu1 }
 0x354   : > { %v1598_v17 = vmul.f32 %v5135_v13, %v5135_v13  ;;  %v5141_v18 = vadd.f32 %v5135_v13, %v5131_v15 }
 0x356   : > { %v5143_v20 = vpop.f32.mrb[2].mxu1  ;;  %v5145_v22 = vadd.f32 %v1598_v17, %v1597_v16 }
 0x357   : > { %v5147_v47 = vpop.f32.mrb[3].mxu1  ;;  %v2977_v23 = vmul.f32 %v5143_v20, %v5143_v20 }
 0x358   : > { %v2973_v25 = vadd.f32 %v5147_v47, %v5143_v20  ;;  %v2978_v27 = vmul.f32 %v5147_v47, %v5147_v47 }
 0x35a   : > { %2974 = vadd.xlane.f32.xlu1 %v2973_v25  ;;  %v2979_v28 = vadd.f32 %v2978_v27, %v2977_v23 }
 0x35c   : > { %2980 = vadd.xlane.f32.xlu0 %v2979_v28 }
 0x36b   : > { %2994 = vperm.xlu1 %4442, %v2972_v29  }
 0x36f   : > { %3014 = vrot.lane.b32.xlu1 %v5161_v30, %s4643_s29 }
 0x370   : > { %4445 = vset.pattern.permute.xlu1 %v4642_v7 }
 0x372   : > { %3000 = vperm.xlu0 %4443, %v2972_v29  }
 0x376   : > { %4444 = vset.pattern.permute.xlu0 %v4641_v6 }
 0x39b   : > { %v1896_v33 = vpop.f32.mrb[4].mxu0 }
 0x39c   : > { %v1903_v34 = vadd.f32 %v1902_v31, %v1896_v33  ;;  %v1919_v2 = vadd.f32 %v1918_v32, %v1896_v33  ;;  %v1898_v35 = vpop.f32.mrb[5].mxu0 }
 0x39d   : > { %v1904_v36 = vadd.f32 %v1902_v31, %v1898_v35  ;;  %v1920_v38 = vadd.f32 %v1918_v32, %v1898_v35 }
 0x39e   : > { %v4232_v39 = vmul.f32 -1.442695, %v1903_v34  ;;  %v4235_v40 = vmul.f32 -1.442695, %v1919_v2 }
 0x39f   : > { %v4233_v1 = vmul.f32 -1.442695, %v1904_v36  ;;  %v4236_v41 = vmul.f32 -1.442695, %v1920_v38 }
 0x3a0   : > { %4454 = vpow2.f32 %v4232_v39 }
 0x3a1   : > { %4456 = vpow2.f32 %v4235_v40 }
 0x3a2   : > { %4458 = vpow2.f32 %v4233_v1 }
 0x3a3   : > { %4460 = vpow2.f32 %v4236_v41 }
 0x3aa   : > { %v4455_v42 = vpop.eup %4454 }
 0x3ab   : > { %v4457_v45 = vpop.eup %4456  ;;  %v1911_v56 = vadd.f32 1.0, %v4455_v42 }
 0x3ac   : > { %v4459_v57 = vpop.eup %4458  ;;  %v1927_v58 = vadd.f32 1.0, %v4457_v45 }
 0x3ad   : > { %v4461_v59 = vpop.eup %4460  ;;  %4462 = vrcp.f32 %v1911_v56  ;;  %v1912_v61 = vadd.f32 1.0, %v4459_v57 }
 0x3ae   : > { %4464 = vrcp.f32 %v1927_v58  ;;  %v1928_v62 = vadd.f32 1.0, %v4461_v59 }
 0x3af   : > { %4466 = vrcp.f32 %v1912_v61 }
 0x3b0   : > { %4468 = vrcp.f32 %v1928_v62 }
 0x3b7   : > { %v4463_v63 = vpop.eup %4462 }
 0x3b8   : > { %v4465_v5 = vpop.eup %4464  ;;  %v1936_v9 = vrot.slane %v4463_v63, %v4985_v60  ;;  %v3007_v63 = vstv %s4255_s4  ;;  %s5789_s4 = smov 88  }
 0x3b9   : > { %v4467_v10 = vpop.eup %4466  ;;  %v1946_v16 = vrot.slane %v4465_v5, %v4959_v51 }
 0x3ba   : > { %v4469_v17 = vpop.eup %4468  ;;  %v1941_v23 = vmul.f32 %v1936_v9, %v1749_v12  ;;  %v1940_v25 = vrot.slane %v4467_v10, %v4985_v60 }
 0x3bb   : > { %v1951_v27 = vmul.f32 %v1946_v16, %v4888_v43  ;;  %v1950_v28 = vrot.slane %v4469_v17, %v4959_v51  ;;  %v5189_v43 = vld [vmem:[%s5712_s10] sm:$0xff] }
 0x3bc   : > { %v1942_v29 = vmul.f32 %v1940_v25, %v5125_v48  ;;  %v5211_v48 = vld [vmem:[%s5717_s15] sm:$0xff] }
 0x3bd   : > { %v5173_v31 = vadd.f32 %v1951_v27, %v1941_v23  ;;  %v1952_v32 = vmul.f32 %v1950_v28, %v4890_v44  ;;  %v5198_v44 = vld [vmem:[%s5712_s10 + $0x8] sm:$0xff] }
 0x3bf   : > { %v5176_v33 = vadd.f32 %v1952_v32, %v1942_v29  ;;  %1965 = vrot.lane.b32.xlu1 %v5173_v31, %s5781_s23 }
 0x3c1   : > { %2143 = vrot.lane.b32.xlu0 %v5176_v33, %s5753_s25  ;;  %3018 = vmatprep.subr.mxu1 %v5176_v33  ;;  %s5783_s25 = smov 112  }
 0x3c2   : > { %3019 = vmatpush1.msra.mxu1 %v5173_v31 }
 0x3c3   : > { %1967 = vrot.lane.b32.xlu1 %v5176_v33, %s5781_s23 }
 0x3c5   : > { %2238 = vrot.lane.b32.xlu0 %v5173_v31, %s5782_s28 }
 0x3c7   : > { %1975 = vrot.lane.b32.xlu1 %v5189_v43, %s4643_s29 }
 0x3c9   : > { %2151 = vrot.lane.b32.xlu0 %v5198_v44, %s5783_s25 }
 0x3cb   : > { %1957 = vrot.lane.b32.xlu1 %v5173_v31, %s5784_s2 }
 0x3cd   : > { %2246 = vrot.lane.b32.xlu0 %v5189_v43, %s5785_s20 }
 0x3cf   : > { %1959 = vrot.lane.b32.xlu1 %v5176_v33, %s5784_s2 }
 0x3d1   : > { %3475 = vrot.lane.b32.xlu0 %v5211_v48, %s5785_s20 }
 0x3d3   : > { %1977 = vrot.lane.b32.xlu1 %v5198_v44, %s4643_s29 }
 0x3d7   : > { %3234 = vrot.lane.b32.xlu1 %v5211_v48, %s4643_s29  ;;  %s4262_s29 = sld [smem:[#allocation2 + $0xa]] }
 0x3db   : > { %2141 = vrot.lane.b32.xlu1 %v5173_v31, %s5786_s24 }
 0x3df   : > { %2149 = vrot.lane.b32.xlu1 %v5189_v43, %s5783_s25 }
 0x3e3   : > { %2240 = vrot.lane.b32.xlu1 %v5176_v33, %s5782_s28 }
 0x3e7   : > { %v2975_v12 = vpop.xlane.xlu1 %2974  ;;  %3390 = vrot.lane.b32.xlu1 %v5211_v48, %s5783_s25 }
 0x3e8   : > { %v2976_v34 = vmul.f32 0.00390625, %v2975_v12 }
 0x3e9   : > { %v2981_v2 = vpop.xlane.xlu0 %2980 }
 0x3ea   : > { %v2983_v35 = vmul.f32 %v2976_v34, %v2976_v34  ;;  %v2982_v36 = vmul.f32 0.00390625, %v2981_v2  ;;  %v2986_v42 = vsub.f32 %v5143_v20, %v2976_v34  ;;  %v2987_v45 = vsub.f32 %v5147_v47, %v2976_v34 }
 0x3eb   : > { %v2995_v38 = vpop.permute.xlu1 %2994  ;;  %2248 = vrot.lane.b32.xlu1 %v5198_v44, %s5785_s20  ;;  %s5787_s20 = smov 127  }
 0x3ec   : > { %v2984_v39 = vsub.f32 %v2982_v36, %v2983_v35 }
 0x3ee   : > { %v2985_v40 = vmax.f32 %v2984_v39, 0.0 }
 0x3ef   : > { %v3015_v1 = vpop.permute.xlu1 %3014 }
 0x3f0   : > { %v2988_v41 = vadd.f32 1e-05, %v2985_v40  ;;  %4260 = vmatmul.mubr.msk.f32.vlgmr.msra.gmra.mrb[4].mxu1 %vm804_vm5, %v3015_v1 }
 0x3f1   : > { %3155 = vmatprep.mubr.f32.mxu1 %v4640_v0  ;;  %v3001_v59 = vpop.permute.xlu0 %3000 }
 0x3f2   : > { %4470 = vrsqrt.f32 %v2988_v41 }
 0x3fc   : > { %v4471_v56 = vpop.eup %4470 }
 0x3fd   : > { %v2990_v57 = vmul.f32 %v4471_v56, %v2986_v42  ;;  %v2991_v58 = vmul.f32 %v4471_v56, %v2987_v45 }
 0x3ff   : > { %v2997_v61 = vmul.f32 %v2995_v38, %v2990_v57  ;;  %v2998_v62 = vmul.f32 %v2995_v38, %v2991_v58 }
 0x401   : > { %v3003_v5 = vadd.f32 %v3001_v59, %v2997_v61  ;;  %v3004_v9 = vadd.f32 %v3001_v59, %v2998_v62 }
 0x403   : > { %v3008_v10 = vmul.f32 %v3007_v63, %v3003_v5  ;;  %vm3006_vm15 = vcmp.ge.f32.partialorder %v3004_v9, 0.0  ;;  %v3009_v16 = vmul.f32 %v3007_v63, %v3004_v9  ;;  %vm3005_vm0 = vcmp.ge.f32.partialorder %v3003_v5, 0.0 }
 0x405   : > { %v5233_v17 = vsel %vm3006_vm15, %v3004_v9, %v3009_v16  ;;  %v5235_v23 = vsel %vm3005_vm0, %v3003_v5, %v3008_v10  ;;  %v3163_v16 = vstv %s4262_s29  ;;  %s5790_s29 = smov 113  }
 0x406   : > { %3091 = vmatprep.subr.mxu1 %v5233_v17 }
 0x407   : > { %3092 = vmatpush1.msra.mxu1 %v5235_v23 }
 0x408   : > { %4261 = vmatmul.mubr.msk.f32.vlgmr.msra.gmra.mrb[4].mxu1 %vm804_vm5, %v5161_v30 }
 0x409   : > { %3302 = vmatprep.mubr.f32.mxu1 %v4640_v0 }
 0x431   : > { %v1966_v20 = vpop.permute.xlu1 %1965 }
 0x433   : > { %v2144_v39 = vpop.permute.xlu0 %2143 }
 0x435   : > { %v1968_v47 = vpop.permute.xlu1 %1967 }
 0x436   : > { %v1969_v25 = vsel %vm788_vm4, %v1966_v20, %v1968_v47  ;;  %v1970_v27 = vsel %vm788_vm4, %v1968_v47, %v1966_v20  ;;  %v3179_v20 = vstv %s4265_s22  ;;  %s5794_s22 = smov 64  }
 0x437   : > { %v1971_v28 = vmul.f32 %v1970_v27, %v4978_v55  ;;  %v1972_v29 = vmul.f32 %v1969_v25, %v4974_v54  ;;  %v2239_v41 = vpop.permute.xlu0 %2238 }
 0x439   : > { %1983 = vmatprep.subr.mxu0 %v1972_v29  ;;  %v1976_v32 = vpop.permute.xlu1 %1975 }
 0x43a   : > { %1984 = vmatpush1.msra.mxu0 %v1971_v28 }
 0x43b   : > { %4237 = vmatmul.mubr.msk.f32.vlgmr.msra.gmra.mrb[6].mxu0 %vm804_vm5, %v1976_v32  ;;  %v2152_v59 = vpop.permute.xlu0 %2151 }
 0x43c   : > { %2053 = vmatprep.mubr.f32.mxu0 %v4640_v0 }
 0x43d   : > { %v1958_v30 = vpop.permute.xlu1 %1957 }
 0x43f   : > { %v2247_v10 = vpop.permute.xlu0 %2246 }
 0x441   : > { %v1960_v12 = vpop.permute.xlu1 %1959 }
 0x442   : > { %v1961_v34 = vsel %vm771_vm6, %v1958_v30, %v1960_v12  ;;  %v1962_v2 = vsel %vm771_vm6, %v1960_v12, %v1958_v30 }
 0x443   : > { %v1963_v35 = vmul.f32 %v1962_v2, %v4992_v3  ;;  %v1964_v36 = vmul.f32 %v1961_v34, %v4996_v4 }
 0x445   : > { %2064 = vmatprep.subr.mxu0 %v1964_v36  ;;  %v1978_v38 = vpop.permute.xlu1 %1977 }
 0x446   : > { %2065 = vmatpush1.msra.mxu0 %v1963_v35 }
 0x447   : > { %4238 = vmatmul.mubr.msk.f32.gmra.mrb[8].mxu0 %vm804_vm5, %v1978_v38 }
 0x448   : > { %2128 = vmatprep.mubr.f32.mxu0 %v4640_v0 }
 0x449   : > { %v5258_v40 = vpop.permute.xlu1 %3234 }
 0x44b   : > { %4239 = vmatmul.mubr.msk.f32.vlgmr.msra.gmra.mrb[6].mxu0 %vm804_vm5, %v5189_v43 }
 0x44c   : > { %2134 = vmatprep.mubr.f32.mxu0 %v4640_v0 }
 0x44d   : > { %v2142_v1 = vpop.permute.xlu1 %2141 }
 0x44e   : > { %v2145_v42 = vsel %vm955_vm7, %v2142_v1, %v2144_v39  ;;  %v2146_v45 = vsel %vm955_vm7, %v2144_v39, %v2142_v1 }
 0x44f   : > { %v2147_v56 = vmul.f32 %v2146_v45, %v5009_v19  ;;  %v2148_v57 = vmul.f32 %v2145_v42, %v5013_v21  ;;  %4240 = vmatmul.mubr.msk.f32.gmra.mrb[8].mxu0 %vm804_vm5, %v5198_v44 }
 0x450   : > { %2221 = vmatprep.mubr.f32.mxu0 %v4640_v0 }
 0x451   : > { %2157 = vmatprep.subr.mxu0 %v2148_v57  ;;  %v2150_v58 = vpop.permute.xlu1 %2149 }
 0x452   : > { %2158 = vmatpush1.msra.mxu0 %v2147_v56 }
 0x453   : > { %4241 = vmatmul.mubr.msk.f32.vlgmr.msra.gmra.mrb[6].mxu0 %vm804_vm5, %v2150_v58 }
 0x454   : > { %2227 = vmatprep.mubr.f32.mxu0 %v4640_v0 }
 0x455   : > { %v2241_v61 = vpop.permute.xlu1 %2240 }
 0x456   : > { %v2242_v62 = vsel %vm1049_vm8, %v2239_v41, %v2241_v61  ;;  %v2243_v63 = vsel %vm1049_vm8, %v2241_v61, %v2239_v41 }
 0x457   : > { %v2244_v5 = vmul.f32 %v2243_v63, %v5025_v26  ;;  %v2245_v9 = vmul.f32 %v2242_v62, %v5029_v14  ;;  %4242 = vmatmul.mubr.msk.f32.gmra.mrb[8].mxu0 %vm804_vm5, %v2152_v59 }
 0x458   : > { %2318 = vmatprep.mubr.f32.mxu0 %v4640_v0 }
 0x459   : > { %2254 = vmatprep.subr.mxu0 %v2245_v9  ;;  %v5286_v35 = vpop.permute.xlu1 %3390 }
 0x45a   : > { %2255 = vmatpush1.msra.mxu0 %v2244_v5 }
 0x45b   : > { %2343 = vmatprep.subr.mxu0 %v5176_v33  ;;  %4243 = vmatmul.mubr.msk.f32.vlgmr.msra.gmra.mrb[6].mxu0 %vm804_vm5, %v2247_v10 }
 0x45c   : > { %2344 = vmatpush1.msra.mxu0 %v5173_v31  ;;  %2324 = vmatprep.mubr.f32.mxu0 %v4640_v0 }
 0x45d   : > { %v2249_v36 = vpop.permute.xlu1 %2248 }
 0x45f   : > { %4244 = vmatmul.mubr.msk.f32.gmra.mrb[8].mxu0 %vm804_vm5, %v2249_v36 }
 0x460   : > { %2407 = vmatprep.mubr.f32.mxu0 %v4640_v0 }
 0x4db   : > { %v3157_v47 = vpop.f32.mrb[4].mxu1 }
 0x4dc   : > { %v3164_v25 = vadd.f32 %v3163_v16, %v3157_v47  ;;  %v3180_v27 = vadd.f32 %v3179_v20, %v3157_v47  ;;  %v3159_v28 = vpop.f32.mrb[5].mxu1 }
 0x4dd   : > { %v3165_v29 = vadd.f32 %v3163_v16, %v3159_v28  ;;  %v3181_v32 = vadd.f32 %v3179_v20, %v3159_v28 }
 0x4de   : > { %v4263_v30 = vmul.f32 -1.442695, %v3164_v25  ;;  %v4266_v12 = vmul.f32 -1.442695, %v3180_v27 }
 0x4df   : > { %v4264_v34 = vmul.f32 -1.442695, %v3165_v29  ;;  %v4267_v2 = vmul.f32 -1.442695, %v3181_v32 }
 0x4e0   : > { %4472 = vpow2.f32 %v4263_v30 }
 0x4e1   : > { %4474 = vpow2.f32 %v4266_v12 }
 0x4e2   : > { %4476 = vpow2.f32 %v4264_v34 }
 0x4e3   : > { %4478 = vpow2.f32 %v4267_v2 }
 0x4ea   : > { %v4473_v38 = vpop.eup %4472 }
 0x4eb   : > { %v4475_v39 = vpop.eup %4474  ;;  %v3172_v1 = vadd.f32 1.0, %v4473_v38 }
 0x4ec   : > { %v4477_v41 = vpop.eup %4476  ;;  %v3188_v42 = vadd.f32 1.0, %v4475_v39 }
 0x4ed   : > { %v4479_v45 = vpop.eup %4478  ;;  %4480 = vrcp.f32 %v3172_v1  ;;  %v3173_v56 = vadd.f32 1.0, %v4477_v41 }
 0x4ee   : > { %4482 = vrcp.f32 %v3188_v42  ;;  %v3189_v57 = vadd.f32 1.0, %v4479_v45 }
 0x4ef   : > { %4484 = vrcp.f32 %v3173_v56 }
 0x4f0   : > { %4486 = vrcp.f32 %v3189_v57 }
 0x4f7   : > { %v4481_v58 = vpop.eup %4480 }
 0x4f8   : > { %v4483_v59 = vpop.eup %4482  ;;  %v3197_v61 = vrot.slane %v4481_v58, %v4985_v60 }
 0x4f9   : > { %v4485_v62 = vpop.eup %4484  ;;  %v3207_v63 = vrot.slane %v4483_v59, %v4959_v51 }
 0x4fa   : > { %v4487_v5 = vpop.eup %4486  ;;  %v3202_v9 = vmul.f32 %v3197_v61, %v5235_v23  ;;  %v3201_v20 = vrot.slane %v4485_v62, %v4985_v60 }
 0x4fb   : > { %v3212_v10 = vmul.f32 %v3207_v63, %v5173_v31  ;;  %v3211_v47 = vrot.slane %v4487_v5, %v4959_v51  ;;  %v5381_v51 = vpop.permute.xlu0 %3475 }
 0x4fc   : > { %v3203_v25 = vmul.f32 %v3201_v20, %v5233_v17 }
 0x4fd   : > { %v5294_v16 = vadd.f32 %v3212_v10, %v3202_v9  ;;  %v3213_v27 = vmul.f32 %v3211_v47, %v5176_v33 }
 0x4ff   : > { %3382 = vrot.lane.b32.xlu0 %v5294_v16, %s5786_s24  ;;  %3225 = vrot.lane.b32.xlu1 %v5294_v16, %s5781_s23  ;;  %v5308_v23 = vadd.f32 %v3213_v27, %v3203_v25 }
 0x503   : > { %2424 = vrot.lane.b32.xlu0 %v5173_v31, %s5787_s20  ;;  %3217 = vrot.lane.b32.xlu1 %v5294_v16, %s5784_s2 }
 0x507   : > { %3467 = vrot.lane.b32.xlu1 %v5294_v16, %s5782_s28  ;;  %3219 = vrot.lane.b32.xlu0 %v5308_v23, %s5784_s2  ;;  %s5791_s2 = smov 80  }
 0x50b   : > { %2337 = vrot.lane.b32.xlu0 %v5198_v44, %s5788_s27  ;;  %3227 = vrot.lane.b32.xlu1 %v5308_v23, %s5781_s23 }
 0x50f   : > { %2432 = vrot.lane.b32.xlu0 %v5189_v43, %s5789_s4  ;;  %2335 = vrot.lane.b32.xlu1 %v5189_v43, %s5788_s27 }
 0x513   : > { %2523 = vrot.lane.b32.xlu0 %v5176_v33, %s5790_s29  ;;  %2426 = vrot.lane.b32.xlu1 %v5176_v33, %s5787_s20 }
 0x517   : > { %3469 = vrot.lane.b32.xlu0 %v5308_v23, %s5782_s28  ;;  %3552 = vrot.lane.b32.xlu1 %v5211_v48, %s5788_s27  ;;  %s5792_s28 = smov 72   ;;  %s5757_s27 = sshll.u32 %s4783_s1, 8 }
 0x51b   : > { %3637 = vrot.lane.b32.xlu0 %v5211_v48, %s5789_s4  ;;  %3384 = vrot.lane.b32.xlu1 %v5308_v23, %s5786_s24  ;;  %s5793_s24 = smov 111  }
 0x51f   : > { %3714 = vrot.lane.b32.xlu0 %v5294_v16, %s5790_s29  ;;  %3629 = vrot.lane.b32.xlu1 %v5294_v16, %s5787_s20 }
 0x523   : > { %2618 = vrot.lane.b32.xlu0 %v5173_v31, %s5783_s25  ;;  %2521 = vrot.lane.b32.xlu1 %v5173_v31, %s5790_s29 }
 0x527   : > { %3631 = vrot.lane.b32.xlu0 %v5308_v23, %s5787_s20  ;;  %2434 = vrot.lane.b32.xlu1 %v5198_v44, %s5789_s4 }
 0x52b   : > { %2531 = vrot.lane.b32.xlu0 %v5198_v44, %s5791_s2  ;;  %2529 = vrot.lane.b32.xlu1 %v5189_v43, %s5791_s2 }
 0x52f   : > { %2626 = vrot.lane.b32.xlu0 %v5189_v43, %s5792_s28  ;;  %2620 = vrot.lane.b32.xlu1 %v5176_v33, %s5783_s25 }
 0x533   : > { %2717 = vrot.lane.b32.xlu0 %v5176_v33, %s5793_s24  ;;  %3722 = vrot.lane.b32.xlu1 %v5211_v48, %s5791_s2  ;;  %s4658_s2 = smov [#allocation5]  }
 0x537   : > { %3801 = vrot.lane.b32.xlu0 %v5308_v23, %s5783_s25  ;;  %3799 = vrot.lane.b32.xlu1 %v5294_v16, %s5783_s25  ;;  %s5558_s25 = sand.u32 1, %s4629_s30  }
 0x538   : > { %s5756_s20 = sshll.u32 %s5558_s25, 4 }
 0x539   : > { %s613_s4 = scalar_lea.vmem [#allocation5], %s5756_s20  ;;  %s4012_s20 = scalar_lea.sflag [#allocation3], %s5558_s25 }
 0x53b   : > { %3807 = vrot.lane.b32.xlu0 %v5211_v48, %s5792_s28  ;;  %3716 = vrot.lane.b32.xlu1 %v5308_v23, %s5790_s29  ;;  %s4036_s29 = sshll.u32 %s613_s4, 4  ;;  %s5574_s29 = int_to_ptr.vmem [resolvable:$true] %s4036_s29 }
 0x53c   : > { %s4511_s5 = scalar_lea.vmem %s5574_s29, 256 }
 0x53d   : > { %p4512_p9 = scmp.ne.s32.totalorder %s5574_s29, %s4511_s5 }
 0x53f   : > { %3884 = vrot.lane.b32.xlu0 %v5294_v16, %s5793_s24  ;;  %2715 = vrot.lane.b32.xlu1 %v5173_v31, %s5793_s24  ;;  %p4513_p10 = pnand %p4512_p9, %p4802_p5 }
 0x541   : > { %p4514_p12 = pneg %p4513_p10 }
 0x543   : > { %2725 = vrot.lane.b32.xlu0 %v5198_v44, %s5794_s22  ;;  %2628 = vrot.lane.b32.xlu1 %v5198_v44, %s5792_s28  ;;  %s4515_s28 = sshll.u32 %s4658_s2, 4  ;;  %s4516_s28 = int_to_ptr.vmem [resolvable:$false] %s4515_s28 }
 0x544   : > { %p4518_p13 = scmp.lt.s32.totalorder %s5574_s29, %s4516_s28 }
 0x547   : > { %2723 = vrot.lane.b32.xlu1 %v5189_v43, %s5794_s22  ;;  %v5387_v43 = vld [vmem:[%s5795_s6] sm:$0xff] }
 0x54b   : > { %3886 = vrot.lane.b32.xlu1 %v5308_v23, %s5793_s24  ;;  %s5572_s24 = scalar_lea.hbm %s5719_s17, %s5757_s27  ;;  %s4517_s27 = scalar_lea.vmem %s4516_s28, 512 }
 0x54c   : > { %p4519_p0 = scmp.lt.s32.totalorder %s4517_s27, %s4511_s5 }
 0x54e   : > { %p4520_p1 = por %p4519_p0, %p4518_p13 }
 0x54f   : > { %3892 = vrot.lane.b32.xlu1 %v5211_v48, %s5794_s22  ;;  %s5550_s22 = sld [smem:[#allocation2 + $0x1]] }
 0x550   : > { %p4521_p2 = pnand %p4520_p1, %p4514_p12 }
 0x562   : > { %1594 = vadd.xlane.f32.xlu0 %v5141_v18 }
 0x571   : > { %v3383_v60 = vpop.permute.xlu0 %3382  ;;  %v3226_v31 = vpop.permute.xlu1 %3225 }
 0x573   : > { %1600 = vadd.xlane.f32.xlu1 %v5145_v22 }
 0x575   : > { %v2425_v33 = vpop.permute.xlu0 %2424  ;;  %v3218_v17 = vpop.permute.xlu1 %3217 }
 0x578   : > { %1614 = vperm.xlu0 %4444, %v5387_v43  }
 0x579   : > { %v3468_v44 = vpop.permute.xlu1 %3467  ;;  %v3220_v28 = vpop.permute.xlu0 %3219 }
 0x57a   : > { %v3221_v18 = vsel %vm771_vm6, %v3218_v17, %v3220_v28  ;;  %v3222_v12 = vsel %vm771_vm6, %v3220_v28, %v3218_v17 }
 0x57b   : > { %v3224_v36 = vmul.f32 %v3221_v18, %v4996_v4  ;;  %v3223_v1 = vmul.f32 %v3222_v12, %v4992_v3 }
 0x57d   : > { %v2338_v29 = vpop.permute.xlu0 %2337  ;;  %v3228_v32 = vpop.permute.xlu1 %3227 }
 0x57e   : > { %v3229_v30 = vsel %vm788_vm4, %v3226_v31, %v3228_v32  ;;  %v3230_v22 = vsel %vm788_vm4, %v3228_v32, %v3226_v31 }
 0x57f   : > { %v3231_v34 = vmul.f32 %v3230_v22, %v4978_v55  ;;  %v3232_v2 = vmul.f32 %v3229_v30, %v4974_v54 }
 0x581   : > { %v2433_v38 = vpop.permute.xlu0 %2432  ;;  %3238 = vmatprep.subr.mxu1 %v3232_v2  ;;  %v2336_v39 = vpop.permute.xlu1 %2335 }
 0x582   : > { %3239 = vmatpush1.msra.mxu1 %v3231_v34  ;;  %4245 = vmatmul.mubr.msk.f32.vlgmr.msra.gmra.mrb[6].mxu0 %vm804_vm5, %v2336_v39 }
 0x583   : > { %4268 = vmatmul.mubr.msk.f32.vlgmr.msra.gmra.mrb[6].mxu1 %vm804_vm5, %v5258_v40  ;;  %3311 = vmatprep.subr.mxu1 %v3224_v36 }
 0x584   : > { %3312 = vmatpush1.msra.mxu1 %v3223_v1  ;;  %3375 = vmatprep.mubr.f32.mxu1 %v4640_v0 }
 0x585   : > { %v2524_v55 = vpop.permute.xlu0 %2523  ;;  %v2427_v41 = vpop.permute.xlu1 %2426  ;;  %2413 = vmatprep.mubr.f32.mxu0 %v4640_v0 }
 0x586   : > { %v2428_v54 = vsel %vm1220_vm9, %v2425_v33, %v2427_v41  ;;  %v2429_v3 = vsel %vm1220_vm9, %v2427_v41, %v2425_v33  ;;  %4246 = vmatmul.mubr.msk.f32.gmra.mrb[8].mxu0 %vm804_vm5, %v2338_v29 }
 0x587   : > { %v2430_v4 = vmul.f32 %v2428_v54, %v5053_v46  ;;  %v2431_v40 = vmul.f32 %v2429_v3, %v5043_v37  ;;  %2504 = vmatprep.mubr.f32.mxu0 %v4640_v0 }
 0x589   : > { %v3470_v42 = vpop.permute.xlu0 %3469  ;;  %2440 = vmatprep.subr.mxu0 %v2431_v40  ;;  %v3553_v45 = vpop.permute.xlu1 %3552 }
 0x58a   : > { %2441 = vmatpush1.msra.mxu0 %v2430_v4  ;;  %v3471_v58 = vsel %vm1049_vm8, %v3468_v44, %v3470_v42 }
 0x58b   : > { %4269 = vmatmul.mubr.msk.f32.vlgmr.msra.gmra.mrb[6].mxu1 %vm804_vm5, %v5211_v48  ;;  %4247 = vmatmul.mubr.msk.f32.vlgmr.msra.gmra.mrb[6].mxu0 %vm804_vm5, %v2433_v38  ;;  %v3472_v48 = vsel %vm1049_vm8, %v3470_v42, %v3468_v44  ;;  %v3474_v5 = vmul.f32 %v3471_v58, %v5029_v14 }
 0x58c   : > { %3458 = vmatprep.mubr.f32.mxu1 %v4640_v0  ;;  %2510 = vmatprep.mubr.f32.mxu0 %v4640_v0  ;;  %v3473_v20 = vmul.f32 %v3472_v48, %v5025_v26 }
 0x58d   : > { %v3638_v56 = vpop.permute.xlu0 %3637  ;;  %v3385_v57 = vpop.permute.xlu1 %3384 }
 0x58e   : > { %v3386_v59 = vsel %vm955_vm7, %v3383_v60, %v3385_v57  ;;  %v3387_v61 = vsel %vm955_vm7, %v3385_v57, %v3383_v60 }
 0x58f   : > { %v3388_v62 = vmul.f32 %v3387_v61, %v5009_v19  ;;  %v3389_v63 = vmul.f32 %v3386_v59, %v5013_v21 }
 0x591   : > { %v3715_v9 = vpop.permute.xlu0 %3714  ;;  %3394 = vmatprep.subr.mxu1 %v3389_v63  ;;  %v3630_v10 = vpop.permute.xlu1 %3629 }
 0x592   : > { %3395 = vmatpush1.msra.mxu1 %v3388_v62 }
 0x593   : > { %4270 = vmatmul.mubr.msk.f32.vlgmr.msra.gmra.mrb[6].mxu1 %vm804_vm5, %v5286_v35  ;;  %3479 = vmatprep.subr.mxu1 %v3474_v5 }
 0x594   : > { %3480 = vmatpush1.msra.mxu1 %v3473_v20  ;;  %3543 = vmatprep.mubr.f32.mxu1 %v4640_v0 }
 0x595   : > { %v2619_v47 = vpop.permute.xlu0 %2618  ;;  %3556 = vmatprep.subr.mxu1 %v5308_v23  ;;  %v2522_v19 = vpop.permute.xlu1 %2521 }
 0x596   : > { %v2525_v21 = vsel %vm1314_vm10, %v2522_v19, %v2524_v55  ;;  %v2526_v14 = vsel %vm1314_vm10, %v2524_v55, %v2522_v19 }
 0x597   : > { %v2527_v26 = vmul.f32 %v2525_v21, %v5070_v8  ;;  %v2528_v25 = vmul.f32 %v2526_v14, %v5057_v49 }
 0x599   : > { %v3632_v27 = vpop.permute.xlu0 %3631  ;;  %2537 = vmatprep.subr.mxu0 %v2528_v25  ;;  %v2435_v35 = vpop.permute.xlu1 %2434 }
 0x59a   : > { %v3634_v60 = vsel %vm1220_vm9, %v3632_v27, %v3630_v10  ;;  %2538 = vmatpush1.msra.mxu0 %v2527_v26  ;;  %v3633_v17 = vsel %vm1220_vm9, %v3630_v10, %v3632_v27 }
 0x59b   : > { %v3636_v23 = vmul.f32 %v3634_v60, %v5043_v37  ;;  %4271 = vmatmul.mubr.msk.f32.vlgmr.msra.gmra.mrb[6].mxu1 %vm804_vm5, %v5381_v51  ;;  %4248 = vmatmul.mubr.msk.f32.gmra.mrb[8].mxu0 %vm804_vm5, %v2435_v35  ;;  %v3635_v44 = vmul.f32 %v3633_v17, %v5053_v46 }
 0x59c   : > { %3557 = vmatpush1.msra.mxu1 %v5294_v16  ;;  %2601 = vmatprep.mubr.f32.mxu0 %v4640_v0 }
 0x59d   : > { %v2532_v31 = vpop.permute.xlu0 %2531  ;;  %3641 = vmatprep.subr.mxu1 %v3636_v23  ;;  %v2530_v33 = vpop.permute.xlu1 %2529  ;;  %3620 = vmatprep.mubr.f32.mxu1 %v4640_v0 }
 0x59f   : > { %4249 = vmatmul.mubr.msk.f32.vlgmr.msra.gmra.mrb[6].mxu0 %vm804_vm5, %v2530_v33 }
 0x5a0   : > { %2607 = vmatprep.mubr.f32.mxu0 %v4640_v0 }
 0x5a1   : > { %v2627_v37 = vpop.permute.xlu0 %2626  ;;  %v2621_v51 = vpop.permute.xlu1 %2620 }
 0x5a2   : > { %v2622_v16 = vsel %vm1408_vm11, %v2619_v47, %v2621_v51  ;;  %v2623_v28 = vsel %vm1408_vm11, %v2621_v51, %v2619_v47 }
 0x5a3   : > { %v2624_v29 = vmul.f32 %v2622_v16, %v5085_v52  ;;  %v2625_v32 = vmul.f32 %v2623_v28, %v5075_v11  ;;  %4272 = vmatmul.mubr.msk.f32.vlgmr.msra.gmra.mrb[6].mxu1 %vm804_vm5, %v3553_v45  ;;  %4250 = vmatmul.mubr.msk.f32.gmra.mrb[8].mxu0 %vm804_vm5, %v2532_v31  ;;  %v3969_v31 = vld [vmem:[%s5718_s16] sm:$0xff] }
 0x5a4   : > { %3642 = vmatpush1.msra.mxu1 %v3635_v44  ;;  %3705 = vmatprep.mubr.f32.mxu1 %v4640_v0 }
 0x5a5   : > { %v2718_v18 = vpop.permute.xlu0 %2717  ;;  %2634 = vmatprep.subr.mxu0 %v2625_v32  ;;  %v3723_v46 = vpop.permute.xlu1 %3722  ;;  %2698 = vmatprep.mubr.f32.mxu0 %v4640_v0 }
 0x5a6   : > { %2635 = vmatpush1.msra.mxu0 %v2624_v29 }
 0x5a7   : > { %4251 = vmatmul.mubr.msk.f32.vlgmr.msra.gmra.mrb[6].mxu0 %vm804_vm5, %v2627_v37 }
 0x5a8   : > { %2704 = vmatprep.mubr.f32.mxu0 %v4640_v0 }
 0x5a9   : > { %v3800_v30 = vpop.permute.xlu1 %3799  ;;  %v3802_v22 = vpop.permute.xlu0 %3801 }
 0x5aa   : > { %v3804_v34 = vsel %vm1408_vm11, %v3802_v22, %v3800_v30  ;;  %v3803_v38 = vsel %vm1408_vm11, %v3800_v30, %v3802_v22 }
 0x5ab   : > { %4273 = vmatmul.mubr.msk.f32.vlgmr.msra.gmra.mrb[6].mxu1 %vm804_vm5, %v3638_v56  ;;  %v3806_v55 = vmul.f32 %v3804_v34, %v5075_v11  ;;  %v3805_v3 = vmul.f32 %v3803_v38, %v5085_v52 }
 0x5ac   : > { %3790 = vmatprep.mubr.f32.mxu1 %v4640_v0 }
 0x5ad   : > { %v3717_v12 = vpop.permute.xlu1 %3716  ;;  %v3808_v41 = vpop.permute.xlu0 %3807 }
 0x5ae   : > { %v3718_v2 = vsel %vm1314_vm10, %v3715_v9, %v3717_v12  ;;  %v3719_v36 = vsel %vm1314_vm10, %v3717_v12, %v3715_v9 }
 0x5af   : > { %v3720_v39 = vmul.f32 %v3718_v2, %v5070_v8  ;;  %v3721_v1 = vmul.f32 %v3719_v36, %v5057_v49 }
 0x5b1   : > { %3726 = vmatprep.subr.mxu1 %v3721_v1  ;;  %v2716_v54 = vpop.permute.xlu1 %2715  ;;  %v3885_v11 = vpop.permute.xlu0 %3884 }
 0x5b2   : > { %v2719_v4 = vsel %vm1502_vm12, %v2716_v54, %v2718_v18  ;;  %v2720_v40 = vsel %vm1502_vm12, %v2718_v18, %v2716_v54  ;;  %3727 = vmatpush1.msra.mxu1 %v3720_v39 }
 0x5b3   : > { %v2721_v42 = vmul.f32 %v5103_v53, %v2719_v4  ;;  %v2722_v8 = vmul.f32 %v5094_v24, %v2720_v40  ;;  %4274 = vmatmul.mubr.msk.f32.vlgmr.msra.gmra.mrb[6].mxu1 %vm804_vm5, %v3723_v46  ;;  %3811 = vmatprep.subr.mxu1 %v3806_v55  ;;  %v1627_v40 = vstv %s5550_s22  ;;  %s5576_s22 = sld [smem:[#allocation2 + $0x5]] }
 0x5b4   : > { %3812 = vmatpush1.msra.mxu1 %v3805_v3  ;;  %3875 = vmatprep.mubr.f32.mxu1 %v4640_v0 }
 0x5b5   : > { %2731 = vmatprep.subr.mxu0 %v2722_v8  ;;  %v2629_v49 = vpop.permute.xlu1 %2628  ;;  %v2726_v45 = vpop.permute.xlu0 %2725 }
 0x5b6   : > { %4252 = vmatmul.mubr.msk.f32.gmra.mrb[8].mxu0 %vm804_vm5, %v2629_v49 }
 0x5b7   : > { %2732 = vmatpush1.msra.mxu0 %v2721_v42  ;;  %2795 = vmatprep.mubr.f32.mxu0 %v4640_v0 }
 0x5b9   : > { %v2724_v52 = vpop.permute.xlu1 %2723 }
 0x5ba   : > { %4253 = vmatmul.mubr.msk.f32.vlgmr.msra.gmra.mrb[6].mxu0 %vm804_vm5, %v2724_v52 }
 0x5bb   : > { %4275 = vmatmul.mubr.msk.f32.vlgmr.msra.gmra.mrb[6].mxu1 %vm804_vm5, %v3808_v41  ;;  %2801 = vmatprep.mubr.f32.mxu0 %v4640_v0 }
 0x5bc   : > { %3960 = vmatprep.mubr.f32.mxu1 %v4640_v0  ;;  %v2812_v0 = vld [vmem:[%s5713_s11] sm:$0xff] }
 0x5bd   : > { %v3887_v56 = vpop.permute.xlu1 %3886  ;;  %2854 = vperm.xlu0 %4444, %v2812_v0  }
 0x5be   : > { %v3888_v57 = vsel %vm1502_vm12, %v3885_v11, %v3887_v56  ;;  %v3889_v58 = vsel %vm1502_vm12, %v3887_v56, %v3885_v11  ;;  %4254 = vmatmul.mubr.msk.f32.gmra.mrb[8].mxu0 %vm804_vm5, %v2726_v45 }
 0x5bf   : > { %v3890_v59 = vmul.f32 %v5103_v53, %v3888_v57  ;;  %v3891_v61 = vmul.f32 %v5094_v24, %v3889_v58 }
 0x5c1   : > { %3896 = vmatprep.subr.mxu1 %v3891_v61  ;;  %v3893_v48 = vpop.permute.xlu1 %3892  ;;  %2859 = vperm.xlu0 %4444, %v2813_v50  }
 0x5c2   : > { %3897 = vmatpush1.msra.mxu1 %v3890_v59 }
 0x5c3   : > { %4276 = vmatmul.mubr.msk.f32.vlgmr.msra.gmra.mrb[6].mxu1 %vm804_vm5, %v3893_v48 }
 0x5c5   : > { %4447 = vset.pattern.permute.xlu0 %v4642_v7 }
 0x5c6   : > { %2867 = vperm.xlu0 %4447, %v2812_v0  }
 0x5ef   : > { %v1595_v33 = vpop.xlane.xlu0 %1594 }
 0x5f0   : > { %v1596_v37 = vmul.f32 0.00390625, %v1595_v33 }
 0x5f2   : > { %v1603_v44 = vmul.f32 %v1596_v37, %v1596_v37  ;;  %v1607_v30 = vsub.f32 %v5135_v13, %v1596_v37 }
 0x5f7   : > { %v1615_v39 = vpop.permute.xlu0 %1614 }
 0x600   : > { %v1601_v17 = vpop.xlane.xlu1 %1600 }
 0x601   : > { %v1602_v51 = vmul.f32 0.00390625, %v1601_v17 }
 0x603   : > { %v1604_v16 = vsub.f32 %v1602_v51, %v1603_v44 }
 0x63c   : > { %v2855_v52 = vpop.permute.xlu0 %2854 }
 0x640   : > { %v2860_v61 = vpop.permute.xlu0 %2859 }
 0x68d   : > { %v5511_v53 = vpop.f32.mrb[6].mxu0 }
 0x68e   : > { %v2822_v24 = vmul.f32 %v5511_v53, %v5511_v53  ;;  %v5515_v62 = vpop.f32.mrb[7].mxu0 }
 0x68f   : > { %v2814_v63 = vadd.f32 %v5515_v62, %v5511_v53  ;;  %v2823_v5 = vmul.f32 %v5515_v62, %v5515_v62 }
 0x691   : > { %2815 = vadd.xlane.f32.xlu1 %v2814_v63  ;;  %v5521_v9 = vpop.f32.mrb[8].mxu0  ;;  %v2826_v10 = vadd.f32 %v2823_v5, %v2822_v24 }
 0x692   : > { %v2824_v20 = vmul.f32 %v5521_v9, %v5521_v9  ;;  %v5525_v47 = vpop.f32.mrb[9].mxu0 }
 0x693   : > { %v2817_v19 = vadd.f32 %v5525_v47, %v5521_v9  ;;  %v2825_v21 = vmul.f32 %v5525_v47, %v5525_v47 }
 0x695   : > { %v2829_v14 = vadd.f32 %v2825_v21, %v2824_v20  ;;  %2818 = vadd.xlane.f32.xlu1 %v2817_v19 }
 0x696   : > { %v5531_v26 = vpop.f32.mrb[6].mxu1 }
 0x697   : > { %v3974_v25 = vmul.f32 %v5531_v26, %v5531_v26  ;;  %v5535_v27 = vpop.f32.mrb[7].mxu1 }
 0x698   : > { %v3970_v35 = vadd.f32 %v5535_v27, %v5531_v26  ;;  %v3975_v60 = vmul.f32 %v5535_v27, %v5535_v27 }
 0x699   : > { %2827 = vadd.xlane.f32.xlu1 %v2826_v10 }
 0x69a   : > { %v3976_v23 = vadd.f32 %v3975_v60, %v3974_v25 }
 0x69d   : > { %2830 = vadd.xlane.f32.xlu1 %v2829_v14 }
 0x6ae   : > { %1620 = vperm.xlu1 %4445, %v5387_v43   ;;  %v1605_v43 = vmax.f32 %v1604_v16, 0.0 }
 0x6b0   : > { %v1608_v28 = vadd.f32 1e-05, %v1605_v43 }
 0x6b2   : > { %4446 = vset.pattern.permute.xlu1 %v4641_v6  ;;  %4488 = vrsqrt.f32 %v1608_v28 }
 0x6b3   : > { %3991 = vperm.xlu1 %4446, %v3969_v31  }
 0x6b7   : > { %4448 = vset.pattern.permute.xlu1 %v4642_v7  ;;  %v1606_v7 = vsub.f32 %v5131_v15, %v1596_v37 }
 0x6b8   : > { %2871 = vperm.xlu1 %4448, %v2813_v50  }
 0x6bc   : > { %v4489_v18 = vpop.eup %4488 }
 0x6bd   : > { %v1610_v2 = vmul.f32 %v4489_v18, %v1606_v7  ;;  %v1611_v36 = vmul.f32 %v4489_v18, %v1607_v30 }
 0x6bf   : > { %v1617_v41 = vmul.f32 %v1615_v39, %v1610_v2  ;;  %v1618_v54 = vmul.f32 %v1615_v39, %v1611_v36 }
 0x6dc   : > { %3971 = vadd.xlane.f32.xlu1 %v3970_v35 }
 0x6e0   : > { %3977 = vadd.xlane.f32.xlu1 %v3976_v23 }
 0x6f1   : > { %3997 = vperm.xlu1 %4448, %v3969_v31  }
 0x71e   : > { %v2816_v29 = vpop.xlane.xlu1 %2815 }
 0x71f   : > { %v5547_v6 = vmul.f32 0.00390625, %v2816_v29 }
 0x721   : > { %v2834_v12 = vmul.f32 %v5547_v6, %v5547_v6 }
 0x722   : > { %v2819_v32 = vpop.xlane.xlu1 %2818 }
 0x723   : > { %v5553_v22 = vmul.f32 0.00390625, %v2819_v32 }
 0x725   : > { %v2835_v13 = vmul.f32 %v5553_v22, %v5553_v22 }
 0x726   : > { %v2828_v46 = vpop.xlane.xlu1 %2827 }
 0x727   : > { %v2832_v34 = vmul.f32 0.00390625, %v2828_v46 }
 0x729   : > { %v2836_v38 = vsub.f32 %v2832_v34, %v2834_v12 }
 0x72a   : > { %v2831_v15 = vpop.xlane.xlu1 %2830 }
 0x72b   : > { %v2838_v1 = vmax.f32 %v2836_v38, 0.0  ;;  %v2833_v55 = vmul.f32 0.00390625, %v2831_v15 }
 0x72d   : > { %v2844_v3 = vadd.f32 1e-05, %v2838_v1  ;;  %v2837_v4 = vsub.f32 %v2833_v55, %v2835_v13 }
 0x72e   : > { %v1621_v42 = vpop.permute.xlu1 %1620 }
 0x72f   : > { %4490 = vrsqrt.f32 %v2844_v3  ;;  %v2839_v8 = vmax.f32 %v2837_v4, 0.0  ;;  %v1623_v49 = vadd.f32 %v1621_v42, %v1617_v41  ;;  %v1624_v11 = vadd.f32 %v1621_v42, %v1618_v54 }
 0x731   : > { %v2845_v45 = vadd.f32 1e-05, %v2839_v8  ;;  %vm1625_vm1 = vcmp.ge.f32.partialorder %v1623_v49, 0.0  ;;  %vm1626_vm2 = vcmp.ge.f32.partialorder %v1624_v11, 0.0  ;;  %v1628_v56 = vmul.f32 %v1627_v40, %v1623_v49 }
 0x732   : > { %v1629_v57 = vmul.f32 %v1627_v40, %v1624_v11 }
 0x733   : > { %4492 = vrsqrt.f32 %v2845_v45  ;;  %v1630_v58 = vsel %vm1625_vm1, %v1623_v49, %v1628_v56 }
 0x734   : > { %v1631_v59 = vsel %vm1626_vm2, %v1624_v11, %v1629_v57  ;;  %1632 = vst [vmem:[%s613_s4] sm:$0xff] %v1630_v58 }
 0x735   : > { %1633 = vst [vmem:[%s613_s4 + $0x8] sm:$0xff] %v1631_v59 }
 0x736   : > { %4524 = shalt.err (!%p4521_p2)
}
 0x737   : > { %s4525_s4 = scalar_lea.hbm %s5572_s24, 256  ;;  %s4529_s2 = scalar_lea.hbm %s5719_s17, 512 }
 0x738   : > { %p4526_p3 = scmp.ne.s32.totalorder %s5572_s24, %s4525_s4  ;;  %p4530_p8 = scmp.lt.u32.totalorder %s5572_s24, %s5719_s17 }
 0x739   : > { %p4531_p11 = scmp.lt.u32.totalorder %s4529_s2, %s4525_s4  ;;  %p4533_p10 = scmp.lt.u32.totalorder %s4525_s4, %s5572_s24 }
 0x73a   : > { %p4527_p4 = pnand %p4526_p3, %p4802_p5 }
 0x73b   : > { %p4532_p9 = por %p4531_p11, %p4530_p8 }
 0x73c   : > { %p4528_p7 = pneg %p4527_p4 }
 0x73d   : > { %p4534_p12 = por %p4533_p10, %p4532_p9 }
 0x73f   : > { %p4535_p13 = pnand %p4534_p12, %p4528_p7 }
 0x741   : > { %4538 = shalt.err (!%p4535_p13)
}
 0x742   : > { %4364 = dma.vmem_to_hbm [thread:$0]  (%p4802_p5), %s5574_s29, 256, %s5572_s24, %s4012_s20   ;;  %v2840_v48 = vsub.f32 %v5511_v53, %v5547_v6  ;;  %v2841_v0 = vsub.f32 %v5515_v62, %v5547_v6  ;;  %v4491_v50 = vpop.eup %4490  ;;  %v5604_v5 = vpop.permute.xlu1 %3991  ;;  %v2842_v20 = vsub.f32 %v5521_v9, %v5553_v22  ;;  %v2843_v19 = vsub.f32 %v5525_v47, %v5553_v22 }
 0x743   : > { %v2868_v10 = vpop.permute.xlu0 %2867  ;;  %v4493_v25 = vpop.eup %4492  ;;  %v2882_v53 = vstv %s5576_s22  ;;  %s4205_s5 = sshll.u32 %s5558_s25, 5  ;;  %s4016_s8 = sand.u32 1, %s4783_s1  }
 0x744   : > { %v2848_v24 = vmul.f32 %v4491_v50, %v2840_v48  ;;  %v2849_v63 = vmul.f32 %v4491_v50, %v2841_v0  ;;  %v2850_v35 = vmul.f32 %v4493_v25, %v2842_v20  ;;  %v2851_v62 = vmul.f32 %v4493_v25, %v2843_v19  ;;  %s620_s6 = scalar_lea.vmem [#allocation6], %s4205_s5  ;;  %s4290_s20 = sshll.u32 %s4783_s1, 9 }
 0x745   : > { %s4049_s7 = sshll.u32 %s620_s6, 4  ;;  %s5619_s24 = scalar_lea.hbm %s5720_s18, %s4290_s20  ;;  %s5614_s7 = int_to_ptr.vmem [resolvable:$true] %s4049_s7 }
 0x746   : > { %v2862_v21 = vmul.f32 %v2855_v52, %v2848_v24  ;;  %v2863_v14 = vmul.f32 %v2855_v52, %v2849_v63  ;;  %v2864_v31 = vmul.f32 %v2860_v61, %v2850_v35  ;;  %v2865_v33 = vmul.f32 %v2860_v61, %v2851_v62  ;;  %v2872_v47 = vpop.permute.xlu1 %2871  ;;  %s5621_s22 = scalar_lea.sflag [#allocation7], %s4016_s8  ;;  %s4539_s4 = scalar_lea.vmem %s5614_s7, 512 }
 0x747   : > { %p4540_p0 = scmp.ne.s32.totalorder %s5614_s7, %s4539_s4  ;;  %s4659_s2 = smov [#allocation6]  }
 0x748   : > { %v2874_v60 = vadd.f32 %v2868_v10, %v2862_v21  ;;  %v2875_v23 = vadd.f32 %v2868_v10, %v2863_v14  ;;  %v2876_v37 = vadd.f32 %v2872_v47, %v2864_v31  ;;  %v2877_v51 = vadd.f32 %v2872_v47, %v2865_v33  ;;  %s4543_s28 = sshll.u32 %s4659_s2, 4  ;;  %s4544_s28 = int_to_ptr.vmem [resolvable:$false] %s4543_s28 }
 0x749   : > { %p4541_p1 = pnand %p4540_p0, %p4802_p5  ;;  %s4545_s5 = scalar_lea.vmem %s4544_s28, 1024 }
 0x74a   : > { %vm2878_vm3 = vcmp.ge.f32.partialorder %v2874_v60, 0.0  ;;  %vm2879_vm4 = vcmp.ge.f32.partialorder %v2875_v23, 0.0  ;;  %v2883_v17 = vmul.f32 %v2882_v53, %v2874_v60  ;;  %v2884_v9 = vmul.f32 %v2882_v53, %v2875_v23  ;;  %p4546_p3 = scmp.lt.s32.totalorder %s5614_s7, %s4544_s28  ;;  %p4547_p4 = scmp.lt.s32.totalorder %s4545_s5, %s4539_s4 }
 0x74b   : > { %vm2880_vm5 = vcmp.ge.f32.partialorder %v2876_v37, 0.0  ;;  %vm2881_vm6 = vcmp.ge.f32.partialorder %v2877_v51, 0.0  ;;  %v2885_v43 = vmul.f32 %v2882_v53, %v2876_v37  ;;  %v2886_v28 = vmul.f32 %v2882_v53, %v2877_v51  ;;  %p4542_p2 = pneg %p4541_p1 }
 0x74c   : > { %v2887_v44 = vsel %vm2878_vm3, %v2874_v60, %v2883_v17  ;;  %v2888_v16 = vsel %vm2879_vm4, %v2875_v23, %v2884_v9  ;;  %p4548_p7 = por %p4547_p4, %p4546_p3 }
 0x74d   : > { %2891 = vst [vmem:[%s620_s6] sm:$0xff] %v2887_v44  ;;  %2892 = vst [vmem:[%s620_s6 + $0x8] sm:$0xff] %v2888_v16  ;;  %v2889_v29 = vsel %vm2880_vm5, %v2876_v37, %v2885_v43  ;;  %v2890_v32 = vsel %vm2881_vm6, %v2877_v51, %v2886_v28 }
 0x74e   : > { %2893 = vst [vmem:[%s620_s6 + $0x10] sm:$0xff] %v2889_v29  ;;  %2894 = vst [vmem:[%s620_s6 + $0x18] sm:$0xff] %v2890_v32  ;;  %p4549_p8 = pnand %p4548_p7, %p4542_p2 }
 0x750   : > { %4552 = shalt.err (!%p4549_p8)
}
 0x751   : > { %s4553_s6 = scalar_lea.hbm %s5619_s24, 512  ;;  %s4557_s27 = scalar_lea.hbm %s5720_s18, 1024 }
 0x752   : > { %p4554_p11 = scmp.ne.s32.totalorder %s5619_s24, %s4553_s6  ;;  %p4558_p12 = scmp.lt.u32.totalorder %s5619_s24, %s5720_s18 }
 0x753   : > { %p4559_p13 = scmp.lt.u32.totalorder %s4557_s27, %s4553_s6  ;;  %p4561_p1 = scmp.lt.u32.totalorder %s4553_s6, %s5619_s24 }
 0x754   : > { %p4555_p9 = pnand %p4554_p11, %p4802_p5 }
 0x755   : > { %p4560_p0 = por %p4559_p13, %p4558_p12 }
 0x756   : > { %p4556_p10 = pneg %p4555_p9 }
 0x757   : > { %p4562_p2 = por %p4561_p1, %p4560_p0 }
 0x759   : > { %p4563_p3 = pnand %p4562_p2, %p4556_p10 }
 0x75b   : > { %4566 = shalt.err (!%p4563_p3)
}
 0x75c   : > { %s4660_s4 = smov 256   ;;  %s4256_s28 = sld [smem:[#allocation2 + $0x9]] }
 0x75d   : > { %4365 = dma.vmem_to_hbm [thread:$0]  (%p4802_p5), %s5614_s7, 512, %s5619_s24, %s5621_s22, %s4660_s4, %s4660_s4, %s5781_s23  }
 0x75e   : > { %s5796_s23 = sshll.u32 %s5558_s25, 4  ;;  %s5797_s5 = sshll.u32 %s4783_s1, 8 }
 0x75f   : > { %s627_s7 = scalar_lea.vmem [#allocation8], %s5796_s23  ;;  %s5657_s20 = scalar_lea.hbm %s5721_s19, %s5797_s5 }
 0x760   : > { %s4066_s24 = sshll.u32 %s627_s7, 4  ;;  %s4661_s1 = smov [#allocation8]   ;;  %s5659_s24 = int_to_ptr.vmem [resolvable:$true] %s4066_s24 }
 0x761   : > { %s4567_s25 = scalar_lea.vmem %s5659_s24, 256  ;;  %s4571_s27 = sshll.u32 %s4661_s1, 4  ;;  %s4572_s27 = int_to_ptr.vmem [resolvable:$false] %s4571_s27 }
 0x762   : > { %v4004_v55 = vstv %s4256_s28  ;;  %p4568_p4 = scmp.ne.s32.totalorder %s5659_s24, %s4567_s25  ;;  %s4573_s29 = scalar_lea.vmem %s4572_s27, 512 }
 0x763   : > { %p4574_p11 = scmp.lt.s32.totalorder %s5659_s24, %s4572_s27  ;;  %p4575_p9 = scmp.lt.s32.totalorder %s4573_s29, %s4567_s25 }
 0x764   : > { %p4569_p7 = pnand %p4568_p4, %p4802_p5 }
 0x765   : > { %p4576_p10 = por %p4575_p9, %p4574_p11 }
 0x766   : > { %p4570_p8 = pneg %p4569_p7 }
 0x768   : > { %p4577_p12 = pnand %p4576_p10, %p4570_p8 }
 0x769   : > { %v3972_v6 = vpop.xlane.xlu1 %3971 }
 0x76a   : > { %v3973_v18 = vmul.f32 0.00390625, %v3972_v6 }
 0x76c   : > { %v3980_v46 = vmul.f32 %v3973_v18, %v3973_v18  ;;  %v3983_v2 = vsub.f32 %v5531_v26, %v3973_v18  ;;  %v3984_v36 = vsub.f32 %v5535_v27, %v3973_v18 }
 0x76d   : > { %v3978_v7 = vpop.xlane.xlu1 %3977 }
 0x76e   : > { %v3979_v30 = vmul.f32 0.00390625, %v3978_v7 }
 0x770   : > { %v3981_v22 = vsub.f32 %v3979_v30, %v3980_v46 }
 0x771   : > { %v3998_v41 = vpop.permute.xlu1 %3997 }
 0x772   : > { %v3982_v12 = vmax.f32 %v3981_v22, 0.0 }
 0x774   : > { %v3985_v34 = vadd.f32 1e-05, %v3982_v12 }
 0x776   : > { %4494 = vrsqrt.f32 %v3985_v34 }
 0x780   : > { %v4495_v38 = vpop.eup %4494 }
 0x781   : > { %v3987_v39 = vmul.f32 %v4495_v38, %v3983_v2  ;;  %v3988_v15 = vmul.f32 %v4495_v38, %v3984_v36 }
 0x783   : > { %v3994_v1 = vmul.f32 %v5604_v5, %v3987_v39  ;;  %v3995_v13 = vmul.f32 %v5604_v5, %v3988_v15 }
 0x785   : > { %v4000_v54 = vadd.f32 %v3998_v41, %v3994_v1  ;;  %v4001_v3 = vadd.f32 %v3998_v41, %v3995_v13 }
 0x787   : > { %vm4002_vm7 = vcmp.ge.f32.partialorder %v4000_v54, 0.0  ;;  %vm4003_vm8 = vcmp.ge.f32.partialorder %v4001_v3, 0.0  ;;  %v4005_v26 = vmul.f32 %v4004_v55, %v4000_v54  ;;  %v4006_v27 = vmul.f32 %v4004_v55, %v4001_v3 }
 0x789   : > { %v4007_v4 = vsel %vm4002_vm7, %v4000_v54, %v4005_v26  ;;  %v4008_v40 = vsel %vm4003_vm8, %v4001_v3, %v4006_v27 }
 0x78a   : > { %4009 = vst [vmem:[%s627_s7] sm:$0xff] %v4007_v4  ;;  %4010 = vst [vmem:[%s627_s7 + $0x8] sm:$0xff] %v4008_v40 }
 0x78b   : > { %4580 = shalt.err (!%p4577_p12)
}
 0x78c   : > { %s4581_s2 = scalar_lea.hbm %s5657_s20, 256  ;;  %s4585_s23 = scalar_lea.hbm %s5721_s19, 512 }
 0x78d   : > { %p4582_p13 = scmp.ne.s32.totalorder %s5657_s20, %s4581_s2  ;;  %p4586_p2 = scmp.lt.u32.totalorder %s5657_s20, %s5721_s19 }
 0x78e   : > { %p4587_p3 = scmp.lt.u32.totalorder %s4585_s23, %s4581_s2  ;;  %p4589_p7 = scmp.lt.u32.totalorder %s4581_s2, %s5657_s20 }
 0x78f   : > { %p4583_p0 = pnand %p4582_p13, %p4802_p5 }
 0x790   : > { %p4588_p4 = por %p4587_p3, %p4586_p2 }
 0x791   : > { %p4584_p1 = pneg %p4583_p0 }
 0x792   : > { %p4590_p8 = por %p4589_p7, %p4588_p4 }
 0x794   : > { %p4591_p11 = pnand %p4590_p8, %p4584_p1 }
 0x796   : > { %4594 = shalt.err (!%p4591_p11)
}
 0x797   : > { %4366 = dma.vmem_to_hbm [thread:$0]  (%p4802_p5), %s5659_s24, 256, %s5657_s20, %s5621_s22  }
 0x798 PF: > { %p4386_p9 = scmp.ge.s32.totalorder %s4637_s21, 2  ;;  %s4078_s6 = sand.u32 1, %s4625_s0  }
 0x799   : > { %s4079_s8 = scalar_lea.sflag [#allocation3], %s4078_s6 }
 0x79a   : > { %p4375_p10 = pnand %p4386_p9, %p4806_p6 }
 0x79c   : > { %4616 = dma.done.wait (!%p4375_p10), %s4079_s8, 256  }
 0x79d   : > { %4618 = vsyncadd (!%p4375_p10), %s4079_s8, 4294967040  ;;  %s5798_s25 = sadd.s32 4294967294, %s4637_s21  }
 0x79e   : > { %s4087_s1 = sand.u32 1, %s5798_s25  }
 0x79f   : > { %s4088_s27 = scalar_lea.sflag [#allocation7], %s4087_s1 }
 0x7a0   : > { %4620 = dma.done.wait (!%p4375_p10), %s4088_s27, 768  }
 0x7a1   : > { %4622 = vsyncadd (!%p4375_p10), %s4088_s27, 4294966528  ;;  %s5799_s21 = sld [smem:[#allocation13_spill]]  ;;  %s5800_s3 = sld [smem:[#allocation12_spill]] }
 0x7a2   : > { %s5801_s20 = sld [smem:[#allocation14_spill]]  ;;  %s5802_s0 = smov %s4629_s30 }
 0x7a7   : > { %p34_p5 = scmp.ge.s32.totalorder %s5799_s21, 4   ;;  %s5803_s30 = smov %s5800_s3 }
 0x7a9   :  { %36 = sbr.rel (!%p34_p5) target bundleno = 16 (0x10), region = 160 }
 0x7b0   :  { %4102 = vsyncpa [#allocation3], 1 }
 0x7b1   :  { %4104 = vsyncpa [#allocation3 + $0x1], 1 }
 0x7b2   :  { %4105 = vsyncpa [#allocation7], 1 }
 0x7b3   :  { %4107 = vsyncpa [#allocation7 + $0x1], 1 }
 0x7b4   :  { %4108 = vsyncpa [#allocation4], 1 }
 0x7b5   :  { %4110 = vsyncpa [#allocation4 + $0x1], 1 }

</bundles_post_ra>
